<compile_context>
chip_gen: v7x
topology: tpu7x:2x2x1
jax: 0.10.0
libtpu: 0.0.40
codegen_flags: <defaults>
</compile_context>

<pallas_src>
import functools

import jax
import jax.numpy as jnp
import numpy as np
from jax import lax
from jax.experimental import pallas as pl
from jax.experimental.pallas import tpu as pltpu


def _round_up(x, m):
    return ((x + m - 1) // m) * m


def _vmem_limit_bytes():
    """Generation-aware scoped-VMEM request: ~3/4 of physical VMEM.

    v7x: 64 MiB physical -> 48 MiB (room for compiler scratch / semaphores);
    v5e/v6e: 128 MiB physical -> 96 MiB (the 16/32 MiB scoped defaults would
    silently cap the row tile far below the HBM-roofline knee).
    """
    phys = 64 * 1024 * 1024  # conservative fallback (= v7x physical VMEM)
    try:
        phys = int(getattr(pltpu.get_tpu_info(), "vmem_capacity_bytes", phys))
    except Exception:
        pass
    return (phys * 3) // 4


def _choose_tm(M, Kp, Cp, vmem_limit):
    """Largest row tile whose double-buffered streamed tiles fit the VMEM budget.

    Resident (grid-constant) operands are counted at 2x (default double-buffered
    pipeline); the streamed a_col / r / out tiles are 2x double-buffered f32.
    """
    resident = 2 * 4 * (Kp * Cp + 8 * Cp)   # Wp^T + (sublane-padded) bias
    headroom = 2 * 1024 * 1024              # compiler internal scratch, sems
    budget = vmem_limit - resident - headroom
    per_row = 2 * 4 * (2 * Kp + Cp)         # a_col (Kp) + out (Kp) + r (Cp)
    tm = 1024
    while tm > 128 and tm * per_row > budget:
        tm //= 2
    # Keep >= 2 grid steps when the problem allows, so both v7x TensorCores
    # (and megacore "parallel" sharding in general) get work.
    while tm > 128 and M <= tm:
        tm //= 2
    return tm


def _lrp_conv_kernel(acol_ref, r_ref, wpt_ref, bias_ref, out_ref, *, eps, precision):
    """z+ LRP core for a conv expressed as an im2col matmul.

    acol_ref: (tm, Kp)  im2col'd activations (zero-padded rows / lanes)
    r_ref:    (tm, Cp)  relevance of the conv output
    wpt_ref:  (Kp, Cp)  clamped weight, pre-transposed (single resident copy)
    bias_ref: (1, Cp)   conv bias (zero-padded)
    out_ref:  (tm, Kp)  c_col = s @ Wp   (fold + a*c happen in the wrapper)
    """
    a_col = acol_ref[...]
    z = jnp.dot(a_col, wpt_ref[...], precision=precision,
                preferred_element_type=jnp.float32)
    z = z + bias_ref[...] + eps
    # Exact EUP reciprocal; approx=True would perturb LRP values near small z.
    s = r_ref[...] * pl.reciprocal(z, approx=False)
    # c_col = s @ Wp = s @ (Wp^T)^T: contract the C_out axis of both operands so
    # the duplicated (Cp, Kp) weight copy is not needed in VMEM.
    out_ref[...] = lax.dot_general(
        s, wpt_ref[...],
        dimension_numbers=(((1,), (1,)), ((), ())),
        precision=precision,
        preferred_element_type=jnp.float32)


def lrp_conv2d_zplus(a, r, weight, bias=None, *, stride=1, padding=0, eps=1e-5,
                     precision=lax.Precision.HIGHEST):
    """LRP z+ backward pass for Conv2d.

    a:      (N, C_in, H, W)          input activations of the conv layer
    r:      (N, C_out, H_out, W_out) relevance at the conv output
    weight: (C_out, C_in, kh, kw)
    bias:   (C_out,) or None
    returns relevance of shape (N, C_in, H, W)
    """
    assert eps > 0.0, "eps must be > 0 (padded channels rely on z = eps != 0)"
    a = a.astype(jnp.float32)
    r = r.astype(jnp.float32)
    N, C_in, H, W = a.shape
    C_out, C_in_w, kh, kw = weight.shape
    assert C_in_w == C_in
    H_out = (H + 2 * padding - kh) // stride + 1
    W_out = (W + 2 * padding - kw) // stride + 1
    assert r.shape == (N, C_out, H_out, W_out)

    # z+ rule: clamp weights at >= 0 (matches the module __init__); bias kept as-is.
    wp = jnp.maximum(weight.astype(jnp.float32), 0.0)
    b = jnp.zeros((C_out,), jnp.float32) if bias is None else bias.astype(jnp.float32)

    # ---- im2col via conv_general_dilated_patches: (N, H_out, W_out, K) ----
    # Feature ordering is channel-major / filter-spatial-minor, matching
    # weight.reshape(C_out, C_in*kh*kw).  HIGHEST precision keeps the identity-
    # kernel patch extraction exact (no bf16 rounding of `a` in the glue).
    a_col = lax.conv_general_dilated_patches(
        a,
        filter_shape=(kh, kw),
        window_strides=(stride, stride),
        padding=((padding, padding), (padding, padding)),
        dimension_numbers=('NCHW', 'OIHW', 'NHWC'),
        precision=lax.Precision.HIGHEST)

    M = N * H_out * W_out
    K = C_in * kh * kw
    a_col_flat = a_col.reshape(M, K)
    r_flat = jnp.transpose(r, (0, 2, 3, 1)).reshape(M, C_out)

    # ---- lane-dense padding (last dims -> multiples of 128), rows -> tm ----
    Kp = _round_up(K, 128)
    Cp = _round_up(C_out, 128)
    vmem_limit = _vmem_limit_bytes()
    tm = _choose_tm(M, Kp, Cp, vmem_limit)
    Mp = _round_up(M, tm)

    a_col_p = jnp.pad(a_col_flat, ((0, Mp - M), (0, Kp - K)))
    r_p = jnp.pad(r_flat, ((0, Mp - M), (0, Cp - C_out)))
    wp_t = jnp.pad(wp.reshape(C_out, K).T, ((0, Kp - K), (0, Cp - C_out)))  # (Kp, Cp)
    b_p = jnp.pad(b, (0, Cp - C_out)).reshape(1, Cp)

    grid = (Mp // tm,)
    c_col_p = pl.pallas_call(
        functools.partial(_lrp_conv_kernel, eps=eps, precision=precision),
        out_shape=jax.ShapeDtypeStruct((Mp, Kp), jnp.float32),
        grid_spec=pltpu.PrefetchScalarGridSpec(
            num_scalar_prefetch=0,
            grid=grid,
            in_specs=[
                pl.BlockSpec((tm, Kp), lambda i: (i, 0)),   # a_col tile (streamed)
                pl.BlockSpec((tm, Cp), lambda i: (i, 0)),   # relevance tile (streamed)
                pl.BlockSpec((Kp, Cp), lambda i: (0, 0)),   # Wp^T (grid-constant)
                pl.BlockSpec((1, Cp), lambda i: (0, 0)),    # bias (grid-constant)
            ],
            out_specs=pl.BlockSpec((tm, Kp), lambda i: (i, 0)),
        ),
        compiler_params=pltpu.CompilerParams(
            dimension_semantics=("parallel",),
            vmem_limit_bytes=int(vmem_limit)),
    )(a_col_p, r_p, wp_t, b_p)

    # ---- col2im fold (XLA glue): c = conv_transpose(s, Wp) ----
    c_col = c_col_p[:M, :K].reshape(N, H_out, W_out, C_in, kh, kw)
    c_col = jnp.transpose(c_col, (0, 3, 4, 5, 1, 2))   # (N, C_in, kh, kw, H_out, W_out)
    c_acc = jnp.zeros((N, C_in, H + 2 * padding, W + 2 * padding), jnp.float32)
    for i in range(kh):
        for j in range(kw):
            c_acc = c_acc.at[:, :,
                             i:i + stride * (H_out - 1) + 1:stride,
                             j:j + stride * (W_out - 1) + 1:stride].add(c_col[:, :, i, j])
    c = c_acc[:, :, padding:padding + H, padding:padding + W]
    return a * c


def _reference(a, r, weight, bias, stride, padding, eps, precision):
    """Pure-JAX reference matching the PyTorch autograd formulation."""
    a = a.astype(jnp.float32)
    wp = jnp.maximum(weight.astype(jnp.float32), 0.0)
    b = (jnp.zeros((weight.shape[0],), jnp.float32) if bias is None
         else bias.astype(jnp.float32))
    dn = lax.conv_dimension_numbers(a.shape, wp.shape, ('NCHW', 'OIHW', 'NCHW'))

    def conv(x):
        return lax.conv_general_dilated(
            x, wp, (stride, stride), [(padding, padding)] * 2,
            dimension_numbers=dn, precision=precision)

    z = conv(a) + b[None, :, None, None] + eps
    s = r.astype(jnp.float32) / z
    c = jax.grad(lambda x: jnp.sum(conv(x) * s))(a)
    return a * c


def _mxu_precision_and_tols():
    """Pick MXU precision (and matching test tolerances).

    Prefer fp32 (HIGHEST) MXU passes for parity with a PyTorch fp32 conv; fall
    back to DEFAULT (single bf16 pass, matching the conv reference's default)
    with a looser tolerance if this jax's Mosaic lowering rejects the argument.
    """
    def probe(x_ref, o_ref):
        o_ref[...] = jnp.dot(x_ref[...], x_ref[...],
                             precision=lax.Precision.HIGHEST,
                             preferred_element_type=jnp.float32)
    try:
        x = jnp.ones((128, 128), jnp.float32)
        jax.block_until_ready(
            pl.pallas_call(probe,
                           out_shape=jax.ShapeDtypeStruct((128, 128), jnp.float32))(x))
        return lax.Precision.HIGHEST, 1e-4, 1e-5
    except Exception:
        return lax.Precision.DEFAULT, 2e-2, 1e-4


if __name__ == "__main__":
    key = jax.random.PRNGKey(0)
    precision, rtol, atol = _mxu_precision_and_tols()

    configs = [
        # (N, C_in, C_out, H, W, k, stride, padding, use_bias)
        (2, 8, 16, 16, 16, 3, 1, 1, True),    # 3x3 "same" conv with bias
        (2, 16, 8, 16, 16, 1, 1, 0, False),   # 1x1 conv, no bias
        (1, 4, 8, 9, 9, 3, 2, 1, True),       # strided 3x3 conv, ragged M
    ]
    for (N, C_in, C_out, H, W, k, stride, padding, use_bias) in configs:
        k1, k2, k3, k4, key = jax.random.split(key, 5)
        H_out = (H + 2 * padding - k) // stride + 1
        W_out = (W + 2 * padding - k) // stride + 1

        # LRP inputs: non-negative (post-ReLU-like) activations and relevance.
        a = jax.random.uniform(k1, (N, C_in, H, W), dtype=jnp.float32)
        r = jax.random.uniform(k2, (N, C_out, H_out, W_out), dtype=jnp.float32)
        w = jax.random.normal(k3, (C_out, C_in, k, k), dtype=jnp.float32) * 0.1
        b = (jnp.abs(jax.random.normal(k4, (C_out,), dtype=jnp.float32)) * 0.1
             if use_bias else None)

        out = lrp_conv2d_zplus(a, r, w, b, stride=stride, padding=padding,
                               eps=1e-5, precision=precision)
        out = jax.block_until_ready(out)
        assert out.shape == a.shape

        ref = _reference(a, r, w, b, stride, padding, eps=1e-5, precision=precision)
        np.testing.assert_allclose(np.asarray(out), np.asarray(ref),
                                   rtol=rtol, atol=atol)

    print("KERNEL_OK")
</pallas_src>

<mosaic_0001>
module attributes {stable_mosaic.version = 11 : i64} {
  func.func @probe(%arg0: memref<128x128xf32, #tpu.memory_space<vmem>>, %arg1: memref<128x128xf32, #tpu.memory_space<vmem>>) attributes {dimension_semantics = [], scalar_prefetch = 0 : i64, scratch_operands = 0 : i64, tpu.core_type = #tpu.core_type<tc>} {
    %c0 = arith.constant 0 : index
    %c0_0 = arith.constant 0 : index
    %0 = vector.load %arg0[%c0, %c0_0] : memref<128x128xf32, #tpu.memory_space<vmem>>, vector<128x128xf32>
    %c0_1 = arith.constant 0 : index
    %c0_2 = arith.constant 0 : index
    %1 = vector.load %arg0[%c0_1, %c0_2] : memref<128x128xf32, #tpu.memory_space<vmem>>, vector<128x128xf32>
    %cst = arith.constant dense<0.000000e+00> : vector<128x128xf32>
    %2 = tpu.matmul %0, %1, %cst {dimension_numbers = #tpu.dot_dimension_numbers<[1], [0], [0], [1], [0, 0, 1, 1], [], []>, precision = #tpu.contract_precision<fp32>} : vector<128x128xf32>, vector<128x128xf32>, vector<128x128xf32> -> vector<128x128xf32>
    %c0_3 = arith.constant 0 : index
    %c0_4 = arith.constant 0 : index
    %3 = vector.load %arg1[%c0_3, %c0_4] : memref<128x128xf32, #tpu.memory_space<vmem>>, vector<128x128xf32>
    tpu.vector_store %arg1[%c0_3, %c0_4], %2 {strides = array<i32>} : memref<128x128xf32, #tpu.memory_space<vmem>>, vector<128x128xf32>,
    return
  }
}

module attributes {stable_mosaic.version = 11 : i64} {
  func.func @_lrp_conv_kernel(%arg0: i32, %arg1: memref<256x128xf32, #tpu.memory_space<vmem>>, %arg2: memref<256x128xf32, #tpu.memory_space<vmem>>, %arg3: memref<128x128xf32, #tpu.memory_space<vmem>>, %arg4: memref<1x128xf32, #tpu.memory_space<vmem>>, %arg5: memref<256x128xf32, #tpu.memory_space<vmem>>) attributes {dimension_semantics = [#tpu.dimension_semantics<parallel>], iteration_bounds = array<i64: 2>, scalar_prefetch = 0 : i64, scratch_operands = 0 : i64, tpu.core_type = #tpu.core_type<tc>, window_params = [{transform_indices = @transform_0, window_bounds = array<i64: 256, 128>}, {transform_indices = @transform_1, window_bounds = array<i64: 256, 128>}, {pipeline_mode = #tpu.pipeline_mode<synchronous>, transform_indices = @transform_2, window_bounds = array<i64: 128, 128>}, {pipeline_mode = #tpu.pipeline_mode<synchronous>, transform_indices = @transform_3, window_bounds = array<i64: 1, 128>}, {transform_indices = @transform_4, window_bounds = array<i64: 256, 128>}]} {
    %c0 = arith.constant 0 : index
    %c0_0 = arith.constant 0 : index
    %0 = vector.load %arg1[%c0, %c0_0] : memref<256x128xf32, #tpu.memory_space<vmem>>, vector<256x128xf32>
    %c0_1 = arith.constant 0 : index
    %c0_2 = arith.constant 0 : index
    %1 = vector.load %arg3[%c0_1, %c0_2] : memref<128x128xf32, #tpu.memory_space<vmem>>, vector<128x128xf32>
    %cst = arith.constant dense<0.000000e+00> : vector<256x128xf32>
    %2 = tpu.matmul %0, %1, %cst {dimension_numbers = #tpu.dot_dimension_numbers<[1], [0], [0], [1], [0, 0, 1, 1], [], []>} : vector<256x128xf32>, vector<128x128xf32>, vector<256x128xf32> -> vector<256x128xf32>
    %c0_3 = arith.constant 0 : index
    %c0_4 = arith.constant 0 : index
    %3 = vector.load %arg4[%c0_3, %c0_4] : memref<1x128xf32, #tpu.memory_space<vmem>>, vector<1x128xf32>
    %4 = vector.broadcast %3 : vector<1x128xf32> to vector<256x128xf32>
    %5 = arith.addf %2, %4 : vector<256x128xf32>
    %cst_5 = arith.constant 9.99999974E-6 : f32
    %6 = vector.broadcast %cst_5 : f32 to vector<256x128xf32>
    %7 = arith.addf %5, %6 : vector<256x128xf32>
    %c0_6 = arith.constant 0 : index
    %c0_7 = arith.constant 0 : index
    %8 = vector.load %arg2[%c0_6, %c0_7] : memref<256x128xf32, #tpu.memory_space<vmem>>, vector<256x128xf32>
    %9 = tpu.reciprocal %7 : vector<256x128xf32> -> vector<256x128xf32>
    %10 = arith.mulf %8, %9 : vector<256x128xf32>
    %c0_8 = arith.constant 0 : index
    %c0_9 = arith.constant 0 : index
    %11 = vector.load %arg3[%c0_8, %c0_9] : memref<128x128xf32, #tpu.memory_space<vmem>>, vector<128x128xf32>
    %cst_10 = arith.constant dense<0.000000e+00> : vector<256x128xf32>
    %12 = tpu.matmul %10, %11, %cst_10 {dimension_numbers = #tpu.dot_dimension_numbers<[1], [1], [0], [0], [0, 0, 1, 0], [], []>} : vector<256x128xf32>, vector<128x128xf32>, vector<256x128xf32> -> vector<256x128xf32>
    %c0_11 = arith.constant 0 : index
    %c0_12 = arith.constant 0 : index
    %13 = vector.load %arg5[%c0_11, %c0_12] : memref<256x128xf32, #tpu.memory_space<vmem>>, vector<256x128xf32>
    tpu.vector_store %arg5[%c0_11, %c0_12], %12 {strides = array<i32>} : memref<256x128xf32, #tpu.memory_space<vmem>>, vector<256x128xf32>,
    return
  }
  func.func @transform_0(%arg0: i32) -> (i32, i32) {
    %c0_i32 = arith.constant 0 : i32
    %c0_i32_0 = arith.constant 0 : i32
    return %arg0, %c0_i32 : i32, i32
  }
  func.func @transform_1(%arg0: i32) -> (i32, i32) {
    %c0_i32 = arith.constant 0 : i32
    %c0_i32_0 = arith.constant 0 : i32
    return %arg0, %c0_i32 : i32, i32
  }
  func.func @transform_2(%arg0: i32) -> (i32, i32) {
    %c0_i32 = arith.constant 0 : i32
    %c0_i32_0 = arith.constant 0 : i32
    %c0_i32_1 = arith.constant 0 : i32
    return %c0_i32, %c0_i32_0 : i32, i32
  }
  func.func @transform_3(%arg0: i32) -> (i32, i32) {
    %c0_i32 = arith.constant 0 : i32
    %c0_i32_0 = arith.constant 0 : i32
    %c0_i32_1 = arith.constant 0 : i32
    return %c0_i32, %c0_i32_0 : i32, i32
  }
  func.func @transform_4(%arg0: i32) -> (i32, i32) {
    %c0_i32 = arith.constant 0 : i32
    %c0_i32_0 = arith.constant 0 : i32
    return %arg0, %c0_i32 : i32, i32
  }
}

</mosaic_0001>

<bundles_post_ra>
// kernel: tpu_custom_call.1
= control target key start
LH: loop header
LB: loop body
LE: loop exit
PB: predicated region body
PF: predicated region fallthrough
CT: control target
= control target key end

     0   :  { %6 = vsyncpa [#allocation3], 0  ;;  %s2594_s0 = inlined_call_operand.hbm [shape: f32[128,128], index: 0, kind: input, shape index: {}]   ;;  %s2595_s1 = inlined_call_operand.hbm [shape: f32[128,128], index: 1, kind: output, shape index: {}]  }
   0x1   :  { %7 = vsyncpa [#allocation4], 0  ;;  %s2210_s6 = smov [#allocation2]   ;;  %s2162_s10 = scalar_lea.hbm %s2594_s0, 2048 }
   0x2   :  { %s13_s7 = sshll.u32 %s2210_s6, 4  ;;  %p2163_p0 = scmp.ne.s32.totalorder %s2594_s0, %s2162_s10  ;;  %s14_s7 = int_to_ptr.vmem [resolvable:$true] %s13_s7 }
   0x3   :  { %p2166_p1 = scmp.lt.u32.totalorder %s2162_s10, %s2594_s0 }
   0x5   :  { %p2168_p2 = pnand %p2166_p1, %p2163_p0 }
   0x7   :  { %2171 = shalt.err (!%p2168_p2)
}
   0x8   :  { %s2172_s15 = scalar_lea.vmem %s14_s7, 2048  ;;  %p2177_p4 = scmp.lt.s32.totalorder %s14_s7, %s14_s7 }
   0x9   :  { %p2173_p3 = scmp.ne.s32.totalorder %s14_s7, %s2172_s15  ;;  %p2178_p5 = scmp.lt.s32.totalorder %s2172_s15, %s2172_s15 }
   0xb   :  { %p2179_p6 = por %p2178_p5, %p2177_p4 }
   0xd   :  { %p2180_p7 = pnand %p2179_p6, %p2173_p3 }
   0xf   :  { %2183 = shalt.err (!%p2180_p7)
}
  0x10   :  { %s2211_s16 = smov 128   ;;  %s2212_s17 = smov 8  }
  0x11   :  { %19 = dma.hbm_to_vmem [thread:$0]  %s2594_s0, 2048, %s14_s7, [#allocation3], %s2211_s16, %s2211_s16, %s2212_s17  }
  0x12   :  { %2206 = dma.done.wait [#allocation3], 2048  }
  0x13   :  { %2207 = vsyncadd [#allocation3], 4294965248  ;;  %v23_v0 = vld [vmem:[#allocation2] sm:$0xff]  ;;  %v24_v1 = vld [vmem:[#allocation2 + $0x8] sm:$0xff]  ;;  %s2213_s0 = smov [#allocation5]  }
  0x14   :  { %v25_v2 = vld [vmem:[#allocation2 + $0x10] sm:$0xff]  ;;  %v2239_v3 = vand.u32 4294901760, %v23_v0  ;;  %v2241_v4 = vand.u32 4294901760, %v24_v1  ;;  %v26_v5 = vld [vmem:[#allocation2 + $0x18] sm:$0xff]  ;;  %v2245_v7 = vld [vmem:[#allocation2 + $0x20] sm:$0xff]  ;;  %s1346_s20 = sshll.u32 %s2213_s0, 4  ;;  %s1347_s20 = int_to_ptr.vmem [resolvable:$true] %s1346_s20 }
  0x15   :  { %v2243_v6 = vand.u32 4294901760, %v25_v2  ;;  %v2247_v8 = vld [vmem:[#allocation2 + $0x28] sm:$0xff]  ;;  %v2249_v9 = vand.u32 4294901760, %v26_v5  ;;  %v2256_v11 = vand.u32 4294901760, %v2245_v7  ;;  %v2265_v14 = vld [vmem:[#allocation2 + $0x30] sm:$0xff]  ;;  %v2267_v15 = vld [vmem:[#allocation2 + $0x38] sm:$0xff]  ;;  %p2189_p9 = scmp.lt.s32.totalorder %s1347_s20, %s1347_s20 }
  0x16   :  { %v2253_v10 = vpack.c.bf16 %v2241_v4, %v2239_v3  ;;  %v2259_v12 = vand.u32 4294901760, %v2247_v8  ;;  %v2274_v16 = vsub.f32 %v23_v0, %v2239_v3  ;;  %v2283_v18 = vand.u32 4294901760, %v2265_v14  ;;  %v2288_v20 = vld [vmem:[#allocation2 + $0x40] sm:$0xff]  ;;  %v2290_v21 = vld [vmem:[#allocation2 + $0x48] sm:$0xff]  ;;  %v2308_v27 = vld [vmem:[#allocation2 + $0x50] sm:$0xff]  ;;  %s2184_s21 = scalar_lea.vmem %s1347_s20, 2048 }
  0x17   :  { %v2263_v13 = vpack.c.bf16 %v2249_v9, %v2243_v6  ;;  %v2286_v19 = vand.u32 4294901760, %v2267_v15  ;;  %v2303_v25 = vand.u32 4294901760, %v2288_v20  ;;  %v2306_v26 = vand.u32 4294901760, %v2290_v21  ;;  %v2310_v28 = vld [vmem:[#allocation2 + $0x58] sm:$0xff]  ;;  %v2329_v34 = vld [vmem:[#allocation2 + $0x60] sm:$0xff]  ;;  %v2331_v35 = vld [vmem:[#allocation2 + $0x68] sm:$0xff]  ;;  %p2185_p8 = scmp.ne.s32.totalorder %s1347_s20, %s2184_s21  ;;  %p2190_p10 = scmp.lt.s32.totalorder %s2184_s21, %s2184_s21 }
  0x18   :  { %1887 = vmatprep.subr.bf16.mxu1 %v2253_v10  ;;  %1983 = vmatprep.subr.bf16.mxu0 %v2253_v10  ;;  %v2280_v17 = vpack.c.bf16 %v2259_v12, %v2256_v11  ;;  %v122_v22 = vand.u32 4294901760, %v2274_v16  ;;  %v2321_v31 = vand.u32 4294901760, %v2308_v27  ;;  %v2324_v32 = vand.u32 4294901760, %v2310_v28  ;;  %v2347_v39 = vld [vmem:[#allocation2 + $0x70] sm:$0xff]  ;;  %v2350_v41 = vld [vmem:[#allocation2 + $0x78] sm:$0xff] }
  0x19   :  { %1889 = vmatpush3.bf16.msra.mxu1 %v2253_v10  ;;  %1985 = vmatpush3.bf16.msra.mxu0 %v2253_v10  ;;  %v2300_v24 = vpack.c.bf16 %v2286_v19, %v2283_v18  ;;  %v2318_v30 = vpack.c.bf16 %v2306_v26, %v2303_v25  ;;  %v2327_v33 = vsub.f32 %v24_v1, %v2241_v4  ;;  %v2342_v37 = vand.u32 4294901760, %v2329_v34  ;;  %p2191_p11 = por %p2190_p10, %p2189_p9 }
  0x1a   :  { %1891 = vmatprep.subr.bf16.mxu1 %v2263_v13  ;;  %1987 = vmatprep.subr.bf16.mxu0 %v2263_v13  ;;  %v123_v23 = vsub.f32 %v2274_v16, %v122_v22  ;;  %v2339_v36 = vpack.c.bf16 %v2324_v32, %v2321_v31  ;;  %v2345_v38 = vand.u32 4294901760, %v2331_v35  ;;  %v2353_v42 = vsub.f32 %v25_v2, %v2243_v6 }
  0x1b   :  { %1750 = vmatprep.mubr.f32.mxu0 %v122_v22  ;;  %v132_v40 = vand.u32 4294901760, %v2327_v33  ;;  %v2356_v43 = vsub.f32 %v26_v5, %v2249_v9  ;;  %v2361_v44 = vand.u32 4294901760, %v2347_v39  ;;  %v2370_v46 = vand.u32 4294901760, %v2350_v41  ;;  %p2192_p12 = pnand %p2191_p11, %p2185_p8 }
  0x1c   :  { %v124_v29 = vand.u32 4294901760, %v123_v23  ;;  %2602 = vst [vmem:[#allocation8_spill] sm:$0xff] %v2339_v36  ;;  %v2367_v45 = vpack.c.bf16 %v2345_v38, %v2342_v37  ;;  %v2375_v48 = vsub.f32 %v2245_v7, %v2256_v11  ;;  %v142_v49 = vand.u32 4294901760, %v2353_v42 }
  0x1d   :  { %1893 = vmatpush3.bf16.msra.mxu1 %v2263_v13  ;;  %1989 = vmatpush3.bf16.msra.mxu0 %v2263_v13  ;;  %v133_v47 = vsub.f32 %v2327_v33, %v132_v40  ;;  %v152_v50 = vand.u32 4294901760, %v2356_v43  ;;  %v2381_v51 = vsub.f32 %v2247_v8, %v2259_v12  ;;  %v2387_v52 = vsub.f32 %v2265_v14, %v2283_v18 }
  0x1e   :  { %1895 = vmatprep.subr.bf16.mxu1 %v2280_v17  ;;  %1991 = vmatprep.subr.bf16.mxu0 %v2280_v17  ;;  %2603 = vst [vmem:[#allocation9_spill] sm:$0xff] %v2367_v45  ;;  %v2391_v53 = vsub.f32 %v2267_v15, %v2286_v19  ;;  %v2397_v54 = vpack.c.bf16 %v2370_v46, %v2361_v44  ;;  %v162_v56 = vand.u32 4294901760, %v2375_v48 }
  0x1f   :  { %1582 = vmatprep.mubr.f32.mxu1 %v124_v29  ;;  %v134_v55 = vand.u32 4294901760, %v133_v47  ;;  %v143_v57 = vsub.f32 %v2353_v42, %v142_v49  ;;  %v153_v58 = vsub.f32 %v2356_v43, %v152_v50  ;;  %v2403_v59 = vand.u32 4294901760, %v2381_v51 }
  0x20   :  { %2604 = vst [vmem:[#allocation10_spill] sm:$0xff] %v2397_v54  ;;  %v2014_v60 = vpack.c.bf16 %v132_v40, %v122_v22  ;;  %v2408_v61 = vand.u32 4294901760, %v2387_v52  ;;  %v2411_v62 = vand.u32 4294901760, %v2391_v53  ;;  %v163_v0 = vsub.f32 %v2375_v48, %v162_v56 }
  0x21   :  { %1897 = vmatpush3.bf16.msra.mxu1 %v2280_v17  ;;  %1993 = vmatpush3.bf16.msra.mxu0 %v2280_v17  ;;  %v1918_v63 = vpack.c.bf16 %v134_v55, %v124_v29  ;;  %v2418_v1 = vsub.f32 %v2288_v20, %v2303_v25  ;;  %v144_v2 = vand.u32 4294901760, %v143_v57  ;;  %v154_v5 = vand.u32 4294901760, %v153_v58 }
  0x22   :  { %1899 = vmatprep.subr.bf16.mxu1 %v2300_v24  ;;  %1995 = vmatprep.subr.bf16.mxu0 %v2300_v24  ;;  %v173_v7 = vsub.f32 %v2381_v51, %v2403_v59  ;;  %v2424_v8 = vsub.f32 %v2290_v21, %v2306_v26  ;;  %v183_v14 = vsub.f32 %v2387_v52, %v2408_v61  ;;  %v164_v22 = vand.u32 4294901760, %v163_v0 }
  0x23   :  { %v193_v15 = vsub.f32 %v2391_v53, %v2411_v62  ;;  %v2018_v20 = vpack.c.bf16 %v152_v50, %v142_v49  ;;  %v202_v23 = vand.u32 4294901760, %v2418_v1  ;;  %v2435_v21 = vsub.f32 %v2308_v27, %v2321_v31 }
  0x24   :  { %v1922_v29 = vpack.c.bf16 %v154_v5, %v144_v2  ;;  %v174_v47 = vand.u32 4294901760, %v173_v7  ;;  %v2438_v57 = vand.u32 4294901760, %v2424_v8  ;;  %v2442_v58 = vsub.f32 %v2310_v28, %v2324_v32 }
  0x25   :  { %1901 = vmatpush3.bf16.msra.mxu1 %v2300_v24  ;;  %1997 = vmatpush3.bf16.msra.mxu0 %v2300_v24  ;;  %v184_v0 = vand.u32 4294901760, %v183_v14  ;;  %v2022_v27 = vpack.c.bf16 %v2403_v59, %v162_v56  ;;  %v222_v7 = vand.u32 4294901760, %v2435_v21 }
  0x26   :  { %1903 = vmatprep.subr.bf16.mxu1 %v2318_v30  ;;  %1999 = vmatprep.subr.bf16.mxu0 %v2318_v30  ;;  %v1926_v28 = vpack.c.bf16 %v174_v47, %v164_v22 }
  0x29   :  { %1905 = vmatpush3.bf16.msra.mxu1 %v2318_v30  ;;  %2001 = vmatpush3.bf16.msra.mxu0 %v2318_v30 }
  0x2a   :  { %1907 = vmatprep.subr.bf16.mxu1 %v2339_v36  ;;  %2003 = vmatprep.subr.bf16.mxu0 %v2339_v36 }
  0x2d   :  { %1909 = vmatpush3.bf16.msra.mxu1 %v2339_v36  ;;  %2005 = vmatpush3.bf16.msra.mxu0 %v2339_v36  ;;  %v2449_v36 = vsub.f32 %v2329_v34, %v2342_v37  ;;  %v2026_v34 = vpack.c.bf16 %v2411_v62, %v2408_v61 }
  0x2e   :  { %1911 = vmatprep.subr.bf16.mxu1 %v2367_v45  ;;  %2007 = vmatprep.subr.bf16.mxu0 %v2367_v45 }
  0x2f   :  { %v242_v14 = vand.u32 4294901760, %v2449_v36 }
  0x31   :  { %1913 = vmatpush3.bf16.msra.mxu1 %v2367_v45  ;;  %2009 = vmatpush3.bf16.msra.mxu0 %v2367_v45  ;;  %v203_v45 = vsub.f32 %v2418_v1, %v202_v23 }
  0x32   :  { %1915 = vmatprep.subr.bf16.mxu1 %v2397_v54  ;;  %2011 = vmatprep.subr.bf16.mxu0 %v2397_v54 }
  0x35   :  { %1917 = vmatpush3.bf16.msra.mxu1 %v2397_v54  ;;  %2013 = vmatpush3.bf16.msra.mxu0 %v2397_v54  ;;  %v194_v54 = vand.u32 4294901760, %v193_v15  ;;  %v2464_v15 = vsub.f32 %v2347_v39, %v2361_v44  ;;  %v2030_v39 = vpack.c.bf16 %v2438_v57, %v202_v23 }
  0x36   :  { %1919 = vmatprep.subr.bf16.mxu1 %v1918_v63  ;;  %2015 = vmatprep.subr.bf16.mxu0 %v2014_v60 }
  0x38   :  { %1583 = vmatmul.mubr.f32.vlgmr.msra.gmra.mrb[0].mxu1 %v134_v55  ;;  %1751 = vmatmul.mubr.f32.vlgmr.msra.gmra.mrb[0].mxu0 %v132_v40  ;;  %v213_v40 = vsub.f32 %v2424_v8, %v2438_v57  ;;  %v232_v55 = vand.u32 4294901760, %v2442_v58 }
  0x39   :  { %1921 = vmatpush3.bf16.msra.mxu1 %v1918_v63  ;;  %2017 = vmatpush3.bf16.msra.mxu0 %v2014_v60  ;;  %v1930_v60 = vpack.c.bf16 %v194_v54, %v184_v0  ;;  %v204_v63 = vand.u32 4294901760, %v203_v45 }
  0x3a   :  { %1585 = vmatprep.mubr.f32.mxu1 %v144_v2  ;;  %1753 = vmatprep.mubr.f32.mxu0 %v142_v49  ;;  %v2456_v49 = vsub.f32 %v2331_v35, %v2345_v38  ;;  %v223_v2 = vsub.f32 %v2435_v21, %v222_v7  ;;  %v214_v35 = vand.u32 4294901760, %v213_v40 }
  0x3b   :  { %1923 = vmatprep.subr.bf16.mxu1 %v1922_v29  ;;  %2019 = vmatprep.subr.bf16.mxu0 %v2018_v20 }
  0x3c   :  { %1586 = vmatmul.mubr.f32.gmra.mrb[2].mxu1 %v154_v5  ;;  %1754 = vmatmul.mubr.f32.gmra.mrb[2].mxu0 %v152_v50  ;;  %v233_v50 = vsub.f32 %v2442_v58, %v232_v55  ;;  %v252_v5 = vand.u32 4294901760, %v2456_v49  ;;  %v224_v45 = vand.u32 4294901760, %v223_v2 }
  0x3d   :  { %1925 = vmatpush3.bf16.msra.mxu1 %v1922_v29  ;;  %2021 = vmatpush3.bf16.msra.mxu0 %v2018_v20  ;;  %v2470_v20 = vsub.f32 %v2350_v41, %v2370_v46  ;;  %v1934_v29 = vpack.c.bf16 %v214_v35, %v204_v63 }
  0x3e   :  { %1588 = vmatprep.mubr.f32.mxu1 %v164_v22  ;;  %1756 = vmatprep.mubr.f32.mxu0 %v162_v56  ;;  %v243_v56 = vsub.f32 %v2449_v36, %v242_v14  ;;  %v262_v22 = vand.u32 4294901760, %v2464_v15  ;;  %v234_v41 = vand.u32 4294901760, %v233_v50  ;;  %v2607_v50 = vld [vmem:[#allocation10_spill] sm:$0xff] }
  0x3f   :  { %1927 = vmatprep.subr.bf16.mxu1 %v1926_v28  ;;  %2023 = vmatprep.subr.bf16.mxu0 %v2022_v27 }
  0x40   :  { %1589 = vmatmul.mubr.f32.gmra.mrb[4].mxu1 %v174_v47  ;;  %1757 = vmatmul.mubr.f32.gmra.mrb[4].mxu0 %v2403_v59  ;;  %v253_v47 = vsub.f32 %v2456_v49, %v252_v5  ;;  %v272_v59 = vand.u32 4294901760, %v2470_v20  ;;  %v263_v40 = vsub.f32 %v2464_v15, %v262_v22 }
  0x41   :  { %1929 = vmatpush3.bf16.msra.mxu1 %v1926_v28  ;;  %2025 = vmatpush3.bf16.msra.mxu0 %v2022_v27  ;;  %v1938_v27 = vpack.c.bf16 %v234_v41, %v224_v45 }
  0x42   :  { %1591 = vmatprep.mubr.f32.mxu1 %v184_v0  ;;  %1759 = vmatprep.mubr.f32.mxu0 %v2408_v61  ;;  %v2034_v61 = vpack.c.bf16 %v232_v55, %v222_v7  ;;  %v244_v0 = vand.u32 4294901760, %v243_v56  ;;  %v254_v28 = vand.u32 4294901760, %v253_v47  ;;  %v273_v2 = vsub.f32 %v2470_v20, %v272_v59 }
  0x43   :  { %1931 = vmatprep.subr.bf16.mxu1 %v1930_v60  ;;  %2027 = vmatprep.subr.bf16.mxu0 %v2026_v34 }
  0x44   :  { %1592 = vmatmul.mubr.f32.gmra.mrb[6].mxu1 %v194_v54  ;;  %1760 = vmatmul.mubr.f32.gmra.mrb[6].mxu0 %v2411_v62  ;;  %v1942_v54 = vpack.c.bf16 %v254_v28, %v244_v0  ;;  %v2038_v62 = vpack.c.bf16 %v252_v5, %v242_v14 }
  0x45   :  { %1933 = vmatpush3.bf16.msra.mxu1 %v1930_v60  ;;  %2029 = vmatpush3.bf16.msra.mxu0 %v2026_v34  ;;  %v274_v60 = vand.u32 4294901760, %v273_v2 }
  0x46   :  { %1594 = vmatprep.mubr.f32.mxu1 %v204_v63  ;;  %1762 = vmatprep.mubr.f32.mxu0 %v202_v23  ;;  %v264_v23 = vand.u32 4294901760, %v263_v40  ;;  %v1958_v63 = vpack.c.bf16 %v2381_v51, %v2375_v48 }
  0x47   :  { %1935 = vmatprep.subr.bf16.mxu1 %v1934_v29  ;;  %2031 = vmatprep.subr.bf16.mxu0 %v2030_v39 }
  0x48   :  { %1595 = vmatmul.mubr.f32.gmra.mrb[8].mxu1 %v214_v35  ;;  %1763 = vmatmul.mubr.f32.gmra.mrb[8].mxu0 %v2438_v57  ;;  %v1946_v34 = vpack.c.bf16 %v274_v60, %v264_v23  ;;  %v2042_v57 = vpack.c.bf16 %v272_v59, %v262_v22  ;;  %v1978_v35 = vpack.c.bf16 %v2470_v20, %v2464_v15 }
  0x49   :  { %1937 = vmatpush3.bf16.msra.mxu1 %v1934_v29  ;;  %2033 = vmatpush3.bf16.msra.mxu0 %v2030_v39 }
  0x4a   :  { %1597 = vmatprep.mubr.f32.mxu1 %v224_v45  ;;  %1765 = vmatprep.mubr.f32.mxu0 %v222_v7  ;;  %v1950_v7 = vpack.c.bf16 %v2327_v33, %v2274_v16 }
  0x4b   :  { %1939 = vmatprep.subr.bf16.mxu1 %v1938_v27  ;;  %2035 = vmatprep.subr.bf16.mxu0 %v2034_v61 }
  0x4c   :  { %1598 = vmatmul.mubr.f32.gmra.mrb[10].mxu1 %v234_v41  ;;  %1766 = vmatmul.mubr.f32.gmra.mrb[10].mxu0 %v232_v55  ;;  %v1954_v55 = vpack.c.bf16 %v2356_v43, %v2353_v42 }
  0x4d   :  { %1941 = vmatpush3.bf16.msra.mxu1 %v1938_v27  ;;  %2037 = vmatpush3.bf16.msra.mxu0 %v2034_v61 }
  0x4e   :  { %1600 = vmatprep.mubr.f32.mxu1 %v244_v0  ;;  %1768 = vmatprep.mubr.f32.mxu0 %v242_v14  ;;  %v1974_v14 = vpack.c.bf16 %v2456_v49, %v2449_v36 }
  0x4f   :  { %1943 = vmatprep.subr.bf16.mxu1 %v1942_v54  ;;  %2039 = vmatprep.subr.bf16.mxu0 %v2038_v62 }
  0x50   :  { %1601 = vmatmul.mubr.f32.gmra.mrb[12].mxu1 %v254_v28  ;;  %1769 = vmatmul.mubr.f32.gmra.mrb[12].mxu0 %v252_v5 }
  0x51   :  { %1945 = vmatpush3.bf16.msra.mxu1 %v1942_v54  ;;  %2041 = vmatpush3.bf16.msra.mxu0 %v2038_v62 }
  0x52   :  { %1603 = vmatprep.mubr.f32.mxu1 %v264_v23  ;;  %1771 = vmatprep.mubr.f32.mxu0 %v262_v22 }
  0x53   :  { %1947 = vmatprep.subr.bf16.mxu1 %v1946_v34  ;;  %2043 = vmatprep.subr.bf16.mxu0 %v2042_v57 }
  0x54   :  { %1604 = vmatmul.mubr.f32.gmra.mrb[14].mxu1 %v274_v60  ;;  %1772 = vmatmul.mubr.f32.gmra.mrb[14].mxu0 %v272_v59 }
  0x55   :  { %1949 = vmatpush3.bf16.msra.mxu1 %v1946_v34  ;;  %2045 = vmatpush3.bf16.msra.mxu0 %v2042_v57 }
  0x56   :  { %1638 = vmatprep.mubr.f32.mxu1 %v2239_v3  ;;  %1806 = vmatprep.mubr.f32.mxu0 %v2239_v3 }
  0x57   :  { %1951 = vmatprep.subr.bf16.mxu1 %v1950_v7  ;;  %2047 = vmatprep.subr.bf16.mxu0 %v2253_v10 }
  0x58   :  { %1639 = vmatmul.mubr.f32.vlgmr.msra.gmra.mrb[0].mxu1 %v2241_v4  ;;  %1807 = vmatmul.mubr.f32.vlgmr.msra.gmra.mrb[0].mxu0 %v2241_v4 }
  0x59   :  { %1953 = vmatpush3.bf16.msra.mxu1 %v1950_v7  ;;  %2049 = vmatpush3.bf16.msra.mxu0 %v2253_v10  ;;  %v1962_v10 = vpack.c.bf16 %v2391_v53, %v2387_v52 }
  0x5a   :  { %1641 = vmatprep.mubr.f32.mxu1 %v2243_v6  ;;  %1809 = vmatprep.mubr.f32.mxu0 %v2243_v6 }
  0x5b   :  { %1955 = vmatprep.subr.bf16.mxu1 %v1954_v55  ;;  %2051 = vmatprep.subr.bf16.mxu0 %v2263_v13 }
  0x5c   :  { %1642 = vmatmul.mubr.f32.gmra.mrb[2].mxu1 %v2249_v9  ;;  %1810 = vmatmul.mubr.f32.gmra.mrb[2].mxu0 %v2249_v9 }
  0x5d   :  { %1957 = vmatpush3.bf16.msra.mxu1 %v1954_v55  ;;  %2053 = vmatpush3.bf16.msra.mxu0 %v2263_v13  ;;  %v1966_v13 = vpack.c.bf16 %v2424_v8, %v2418_v1 }
  0x5e   :  { %1644 = vmatprep.mubr.f32.mxu1 %v2256_v11  ;;  %1812 = vmatprep.mubr.f32.mxu0 %v2256_v11 }
  0x5f   :  { %1959 = vmatprep.subr.bf16.mxu1 %v1958_v63  ;;  %2055 = vmatprep.subr.bf16.mxu0 %v2280_v17 }
  0x60   :  { %1645 = vmatmul.mubr.f32.gmra.mrb[4].mxu1 %v2259_v12  ;;  %1813 = vmatmul.mubr.f32.gmra.mrb[4].mxu0 %v2259_v12 }
  0x61   :  { %1961 = vmatpush3.bf16.msra.mxu1 %v1958_v63  ;;  %2057 = vmatpush3.bf16.msra.mxu0 %v2280_v17  ;;  %v1970_v17 = vpack.c.bf16 %v2442_v58, %v2435_v21 }
  0x62   :  { %1647 = vmatprep.mubr.f32.mxu1 %v2283_v18  ;;  %1815 = vmatprep.mubr.f32.mxu0 %v2283_v18 }
  0x63   :  { %1963 = vmatprep.subr.bf16.mxu1 %v1962_v10  ;;  %2059 = vmatprep.subr.bf16.mxu0 %v2300_v24 }
  0x64   :  { %1648 = vmatmul.mubr.f32.gmra.mrb[6].mxu1 %v2286_v19  ;;  %1816 = vmatmul.mubr.f32.gmra.mrb[6].mxu0 %v2286_v19 }
  0x65   :  { %1965 = vmatpush3.bf16.msra.mxu1 %v1962_v10  ;;  %2061 = vmatpush3.bf16.msra.mxu0 %v2300_v24  ;;  %v2605_v24 = vld [vmem:[#allocation8_spill] sm:$0xff] }
  0x66   :  { %1650 = vmatprep.mubr.f32.mxu1 %v2303_v25  ;;  %1818 = vmatprep.mubr.f32.mxu0 %v2303_v25 }
  0x67   :  { %1967 = vmatprep.subr.bf16.mxu1 %v1966_v13  ;;  %2063 = vmatprep.subr.bf16.mxu0 %v2318_v30 }
  0x68   :  { %1651 = vmatmul.mubr.f32.gmra.mrb[8].mxu1 %v2306_v26  ;;  %1819 = vmatmul.mubr.f32.gmra.mrb[8].mxu0 %v2306_v26 }
  0x69   :  { %1969 = vmatpush3.bf16.msra.mxu1 %v1966_v13  ;;  %2065 = vmatpush3.bf16.msra.mxu0 %v2318_v30  ;;  %v2606_v30 = vld [vmem:[#allocation9_spill] sm:$0xff] }
  0x6a   :  { %1653 = vmatprep.mubr.f32.mxu1 %v2321_v31  ;;  %1821 = vmatprep.mubr.f32.mxu0 %v2321_v31 }
  0x6b   :  { %1971 = vmatprep.subr.bf16.mxu1 %v1970_v17  ;;  %2067 = vmatprep.subr.bf16.mxu0 %v2605_v24 }
  0x6c   :  { %1654 = vmatmul.mubr.f32.gmra.mrb[10].mxu1 %v2324_v32  ;;  %1822 = vmatmul.mubr.f32.gmra.mrb[10].mxu0 %v2324_v32 }
  0x6d   :  { %1973 = vmatpush3.bf16.msra.mxu1 %v1970_v17  ;;  %2069 = vmatpush3.bf16.msra.mxu0 %v2605_v24 }
  0x6e   :  { %1656 = vmatprep.mubr.f32.mxu1 %v2342_v37  ;;  %1824 = vmatprep.mubr.f32.mxu0 %v2342_v37 }
  0x6f   :  { %1975 = vmatprep.subr.bf16.mxu1 %v1974_v14  ;;  %2071 = vmatprep.subr.bf16.mxu0 %v2606_v30 }
  0x70   :  { %1657 = vmatmul.mubr.f32.gmra.mrb[12].mxu1 %v2345_v38  ;;  %1825 = vmatmul.mubr.f32.gmra.mrb[12].mxu0 %v2345_v38 }
  0x71   :  { %1977 = vmatpush3.bf16.msra.mxu1 %v1974_v14  ;;  %2073 = vmatpush3.bf16.msra.mxu0 %v2606_v30 }
  0x72   :  { %1659 = vmatprep.mubr.f32.mxu1 %v2361_v44  ;;  %1827 = vmatprep.mubr.f32.mxu0 %v2361_v44 }
  0x73   :  { %1979 = vmatprep.subr.bf16.mxu1 %v1978_v35  ;;  %2075 = vmatprep.subr.bf16.mxu0 %v2607_v50 }
  0x74   :  { %1660 = vmatmul.mubr.f32.gmra.mrb[14].mxu1 %v2370_v46  ;;  %1828 = vmatmul.mubr.f32.gmra.mrb[14].mxu0 %v2370_v46 }
  0x75   :  { %1981 = vmatpush3.bf16.msra.mxu1 %v1978_v35  ;;  %2077 = vmatpush3.bf16.msra.mxu0 %v2607_v50 }
  0x76   :  { %1694 = vmatprep.mubr.f32.mxu1 %v2274_v16  ;;  %1862 = vmatprep.mubr.f32.mxu0 %v2239_v3 }
  0x78   :  { %1695 = vmatmul.mubr.f32.vlgmr.msra.gmra.mrb[0].mxu1 %v2327_v33  ;;  %1863 = vmatmul.mubr.f32.vlgmr.msra.gmra.mrb[0].mxu0 %v2241_v4 }
  0x79   :  { %1697 = vmatprep.mubr.f32.mxu1 %v2353_v42  ;;  %1865 = vmatprep.mubr.f32.mxu0 %v2243_v6 }
  0x7c   :  { %1698 = vmatmul.mubr.f32.gmra.mrb[2].mxu1 %v2356_v43  ;;  %1866 = vmatmul.mubr.f32.gmra.mrb[2].mxu0 %v2249_v9 }
  0x7d   :  { %1700 = vmatprep.mubr.f32.mxu1 %v2375_v48  ;;  %1868 = vmatprep.mubr.f32.mxu0 %v2256_v11 }
  0x80   :  { %1701 = vmatmul.mubr.f32.gmra.mrb[4].mxu1 %v2381_v51  ;;  %1869 = vmatmul.mubr.f32.gmra.mrb[4].mxu0 %v2259_v12 }
  0x81   :  { %1703 = vmatprep.mubr.f32.mxu1 %v2387_v52  ;;  %1871 = vmatprep.mubr.f32.mxu0 %v2283_v18 }
  0x84   :  { %1704 = vmatmul.mubr.f32.gmra.mrb[6].mxu1 %v2391_v53  ;;  %1872 = vmatmul.mubr.f32.gmra.mrb[6].mxu0 %v2286_v19 }
  0x85   :  { %1706 = vmatprep.mubr.f32.mxu1 %v2418_v1  ;;  %1874 = vmatprep.mubr.f32.mxu0 %v2303_v25 }
  0x88   :  { %1707 = vmatmul.mubr.f32.gmra.mrb[8].mxu1 %v2424_v8  ;;  %1875 = vmatmul.mubr.f32.gmra.mrb[8].mxu0 %v2306_v26 }
  0x89   :  { %1709 = vmatprep.mubr.f32.mxu1 %v2435_v21  ;;  %1877 = vmatprep.mubr.f32.mxu0 %v2321_v31 }
  0x8c   :  { %1710 = vmatmul.mubr.f32.gmra.mrb[10].mxu1 %v2442_v58  ;;  %1878 = vmatmul.mubr.f32.gmra.mrb[10].mxu0 %v2324_v32 }
  0x8d   :  { %1712 = vmatprep.mubr.f32.mxu1 %v2449_v36  ;;  %1880 = vmatprep.mubr.f32.mxu0 %v2342_v37 }
  0x90   :  { %1713 = vmatmul.mubr.f32.gmra.mrb[12].mxu1 %v2456_v49  ;;  %1881 = vmatmul.mubr.f32.gmra.mrb[12].mxu0 %v2345_v38 }
  0x91   :  { %1715 = vmatprep.mubr.f32.mxu1 %v2464_v15  ;;  %1883 = vmatprep.mubr.f32.mxu0 %v2361_v44 }
  0x94   :  { %1716 = vmatmul.mubr.f32.gmra.mrb[14].mxu1 %v2470_v20  ;;  %1884 = vmatmul.mubr.f32.gmra.mrb[14].mxu0 %v2370_v46 }
 0x14b   :  { %v1696_v3 = vpop.f32.mrb[0].mxu1  ;;  %v1864_v4 = vpop.f32.mrb[0].mxu0 }
 0x14c   :  { %v2078_v6 = vadd.f32 %v1864_v4, %v1696_v3  ;;  %v621_v9 = vpop.f32.mrb[1].mxu1  ;;  %v1231_v11 = vpop.f32.mrb[1].mxu0 }
 0x14d   :  { %v2079_v12 = vadd.f32 %v1231_v11, %v621_v9 }
 0x14e   :  { %1326 = vst [vmem:[#allocation5 + $0x8] sm:$0xff] %v2078_v6 }
 0x14f   :  { %1325 = vst [vmem:[#allocation5] sm:$0xff] %v2079_v12  ;;  %v1699_v16 = vpop.f32.mrb[2].mxu1  ;;  %v1867_v18 = vpop.f32.mrb[2].mxu0 }
 0x150   :  { %v2080_v19 = vadd.f32 %v1867_v18, %v1699_v16  ;;  %v635_v25 = vpop.f32.mrb[3].mxu1  ;;  %v1243_v26 = vpop.f32.mrb[3].mxu0 }
 0x151   :  { %v2081_v31 = vadd.f32 %v1243_v26, %v635_v25 }
 0x152   :  { %1328 = vst [vmem:[#allocation5 + $0x18] sm:$0xff] %v2080_v19 }
 0x153   :  { %1327 = vst [vmem:[#allocation5 + $0x10] sm:$0xff] %v2081_v31  ;;  %v1702_v32 = vpop.f32.mrb[4].mxu1  ;;  %v1870_v33 = vpop.f32.mrb[4].mxu0 }
 0x154   :  { %v2082_v36 = vadd.f32 %v1870_v33, %v1702_v32  ;;  %v649_v37 = vpop.f32.mrb[5].mxu1  ;;  %v1255_v38 = vpop.f32.mrb[5].mxu0 }
 0x155   :  { %v2083_v42 = vadd.f32 %v1255_v38, %v649_v37 }
 0x156   :  { %1330 = vst [vmem:[#allocation5 + $0x28] sm:$0xff] %v2082_v36 }
 0x157   :  { %1329 = vst [vmem:[#allocation5 + $0x20] sm:$0xff] %v2083_v42  ;;  %v1705_v43 = vpop.f32.mrb[6].mxu1  ;;  %v1873_v44 = vpop.f32.mrb[6].mxu0 }
 0x158   :  { %v2084_v46 = vadd.f32 %v1873_v44, %v1705_v43  ;;  %v663_v48 = vpop.f32.mrb[7].mxu1  ;;  %v1267_v51 = vpop.f32.mrb[7].mxu0 }
 0x159   :  { %v2085_v52 = vadd.f32 %v1267_v51, %v663_v48 }
 0x15a   :  { %1332 = vst [vmem:[#allocation5 + $0x38] sm:$0xff] %v2084_v46 }
 0x15b   :  { %1331 = vst [vmem:[#allocation5 + $0x30] sm:$0xff] %v2085_v52  ;;  %v1708_v53 = vpop.f32.mrb[8].mxu1  ;;  %v1876_v1 = vpop.f32.mrb[8].mxu0 }
 0x15c   :  { %v2086_v8 = vadd.f32 %v1876_v1, %v1708_v53  ;;  %v677_v21 = vpop.f32.mrb[9].mxu1  ;;  %v1279_v58 = vpop.f32.mrb[9].mxu0 }
 0x15d   :  { %v2087_v49 = vadd.f32 %v1279_v58, %v677_v21 }
 0x15e   :  { %1334 = vst [vmem:[#allocation5 + $0x48] sm:$0xff] %v2086_v8 }
 0x15f   :  { %1333 = vst [vmem:[#allocation5 + $0x40] sm:$0xff] %v2087_v49  ;;  %v1711_v15 = vpop.f32.mrb[10].mxu1  ;;  %v1879_v5 = vpop.f32.mrb[10].mxu0 }
 0x160   :  { %v2088_v20 = vadd.f32 %v1879_v5, %v1711_v15  ;;  %v691_v39 = vpop.f32.mrb[11].mxu1  ;;  %v1291_v45 = vpop.f32.mrb[11].mxu0 }
 0x161   :  { %v2089_v56 = vadd.f32 %v1291_v45, %v691_v39 }
 0x162   :  { %1336 = vst [vmem:[#allocation5 + $0x58] sm:$0xff] %v2088_v20 }
 0x163   :  { %1335 = vst [vmem:[#allocation5 + $0x50] sm:$0xff] %v2089_v56  ;;  %v1714_v22 = vpop.f32.mrb[12].mxu1  ;;  %v1882_v29 = vpop.f32.mrb[12].mxu0 }
 0x164   :  { %v2090_v41 = vadd.f32 %v1882_v29, %v1714_v22  ;;  %v705_v47 = vpop.f32.mrb[13].mxu1  ;;  %v1303_v59 = vpop.f32.mrb[13].mxu0 }
 0x165   :  { %v2091_v61 = vadd.f32 %v1303_v59, %v705_v47 }
 0x166   :  { %1338 = vst [vmem:[#allocation5 + $0x68] sm:$0xff] %v2090_v41 }
 0x167   :  { %1337 = vst [vmem:[#allocation5 + $0x60] sm:$0xff] %v2091_v61  ;;  %v1717_v0 = vpop.f32.mrb[14].mxu1  ;;  %v1885_v27 = vpop.f32.mrb[14].mxu0 }
 0x168   :  { %v2092_v28 = vadd.f32 %v1885_v27, %v1717_v0  ;;  %v719_v40 = vpop.f32.mrb[15].mxu1  ;;  %v1315_v2 = vpop.f32.mrb[15].mxu0 }
 0x169   :  { %v2093_v54 = vadd.f32 %v1315_v2, %v719_v40 }
 0x16a   :  { %1340 = vst [vmem:[#allocation5 + $0x78] sm:$0xff] %v2092_v28 }
 0x16b   :  { %1339 = vst [vmem:[#allocation5 + $0x70] sm:$0xff] %v2093_v54 }
 0x16c   :  { %2195 = shalt.err (!%p2192_p12)
}
 0x16d   :  { %s2196_s24 = scalar_lea.hbm %s2595_s1, 2048 }
 0x16e   :  { %p2197_p13 = scmp.ne.s32.totalorder %s2595_s1, %s2196_s24  ;;  %p2200_p0 = scmp.lt.u32.totalorder %s2196_s24, %s2595_s1 }
 0x170   :  { %p2202_p1 = pnand %p2200_p0, %p2197_p13 }
 0x172   :  { %2205 = shalt.err (!%p2202_p1)
}
 0x173   :  { %1352 = dma.vmem_to_hbm [thread:$0]  %s1347_s20, 2048, %s2595_s1, [#allocation4], %s2211_s16, %s2211_s16, %s2212_s17  }
 0x174   :  { %2208 = dma.done.wait [#allocation4], 2048  }
 0x175   :  { %2209 = vsyncadd [#allocation4], 4294965248 }
 0x176   :  { %1356 = vsyncpa [#allocation3], 1 }
 0x177   :  { %1357 = vsyncpa [#allocation4], 1 }

// kernel: tpu_custom_call.1
= control target key start
LH: loop header
LB: loop body
LE: loop exit
PB: predicated region body
PF: predicated region fallthrough
CT: control target
= control target key end

     0   :  { %s2198_s0 = inlined_call_operand.hbm [shape: f32[512,128], index: 0, kind: input, shape index: {}]   ;;  %s2199_s1 = inlined_call_operand.hbm [shape: f32[512,128], index: 1, kind: input, shape index: {}]   ;;  %s2200_s2 = inlined_call_operand.hbm [shape: f32[128,128], index: 2, kind: input, shape index: {}]   ;;  %s2201_s3 = inlined_call_operand.vmem [shape: f32[1,128], index: 3, kind: input, shape index: {}]   ;;  %s2202_s4 = inlined_call_operand.hbm [shape: f32[512,128], index: 4, kind: output, shape index: {}]  }
   0x1   :  { %2210 = sst [smem:[#allocation14_spill]] %s2198_s0 }
   0x2   :  { %2211 = sst [smem:[#allocation15_spill]] %s2200_s2 }
   0x3   :  { %9 = vsyncpa [#allocation3], 0 }
   0x4   :  { %11 = vsyncpa [#allocation3 + $0x1], 0 }
   0x5   :  { %12 = vsyncpa [#allocation6], 0 }
   0x6   :  { %14 = vsyncpa [#allocation6 + $0x1], 0 }
   0x7   :  { %15 = vsyncpa [#allocation4], 0 }
   0x8   :  { %17 = vsyncpa [#allocation4 + $0x1], 0  ;;  %s1744_s15 = smov 0   ;;  %s1746_s16 = smov 0  }
   0x9   :  { %s1748_s17 = smov 0   ;;  %s1750_s18 = smov 0  }
   0xa LB: > { %s1765_s19 = sadd.s32 4294967295, %s1709_s18   ;;  %s1057_s20 = sadd.s32 4294967294, %s1709_s18   ;;  %s1709_s18 = sphi %s1750_s18, %s2234_s18   ;;  %s1705_s17 = sphi %s1748_s17, %s2233_s17   ;;  %s1701_s16 = sphi %s1746_s16, %s2232_s16   ;;  %s1697_s15 = sphi %s1744_s15, %s2231_s15  }
   0xb   : > { %p43_p0 = scmp.ne.s32.totalorder %s1701_s16, %s1697_s15  ;;  %p2203_p1 = scmp.eq.s32.totalorder %s1765_s19, 0 }
   0xc   : > { %p141_p3 = scmp.eq.s32.totalorder %s1057_s20, 1  ;;  %p1058_p5 = scmp.ge.s32.totalorder %s1709_s18, 1 }
   0xd   : > { %p1774_p4 = por %p2203_p1, %p43_p0  ;;  %p148_p7 = scmp.lt.s32.totalorder %s1709_s18, 3 }
   0xe   : > { %p1779_p6 = por %p141_p3, %p43_p0  ;;  %s1711_s24 = smov [#allocation7]  }
   0xf   : > { %s2212_s21 = scalar_select %p1774_p4, 1, 0 }
  0x10   : > { %s2213_s22 = scalar_select %p1779_p6, 1, 0 }
  0x11   : > { %p1784_p8 = pnand %p1058_p5, %p148_p7  ;;  %s160_s25 = sshll.u32 %s1711_s24, 4  ;;  %s1788_s25 = int_to_ptr.vmem [resolvable:$true] %s160_s25 }
  0x12   : > { %s1800_s27 = sadd.s32 1, %s1709_s18   ;;  %s30_s28 = sadd.s32 1, %s1705_s17 }
  0x13   : > { %s2214_s23 = scalar_select %p1784_p8, 1, 0 }
  0x14   : > { %p1427_p9 = pneg %p1784_p8  ;;  %s27_s29 = ssub.s32 %s1709_s18, %s1800_s27 }
  0x15   : > { %s2216_s2 = sld [smem:[#allocation15_spill]] }
  0x16   : > { %p1795_p11 = pnand %p1427_p9, %p2203_p1 }
  0x18   : > { %p1549_p13 = pneg %p1795_p11 }
  0x1b   : > { %s1547_s6 = scalar_lea.hbm %s2216_s2, 2048 }
  0x1c   : > { %p1548_p12 = scmp.ne.s32.totalorder %s2216_s2, %s1547_s6  ;;  %p1554_p5 = scmp.lt.u32.totalorder %s1547_s6, %s2216_s2 }
  0x1e   : > { %p1550_p0 = pnand %p1549_p13, %p1548_p12 }
  0x20   : > { %p1551_p3 = pneg %p1550_p0 }
  0x22   : > { %p1556_p7 = pnand %p1554_p5, %p1551_p3 }
  0x24   : > { %1559 = shalt.err (!%p1556_p7)
}
  0x25   : > { %s1560_s11 = scalar_lea.vmem %s1788_s25, 2048  ;;  %p1568_p2 = scmp.lt.s32.totalorder %s1788_s25, %s1788_s25 }
  0x26   : > { %p1561_p9 = scmp.ne.s32.totalorder %s1788_s25, %s1560_s11  ;;  %p1569_p6 = scmp.lt.s32.totalorder %s1560_s11, %s1560_s11 }
  0x28   : > { %p1563_p10 = pnand %p1561_p9, %p1549_p13  ;;  %p1570_p4 = por %p1569_p6, %p1568_p2 }
  0x2a   : > { %p1564_p1 = pneg %p1563_p10 }
  0x2c   : > { %p1571_p8 = pnand %p1570_p4, %p1564_p1 }
  0x2e   : > { %1574 = shalt.err (!%p1571_p8)
}
  0x2f   : > { %s2206_s12 = smov 128   ;;  %s2208_s13 = smov 8  }
  0x30   : > { %1430 = dma.hbm_to_vmem [thread:$0]  (!%p1795_p11), %s2216_s2, 2048, %s1788_s25, [#allocation6], %s2206_s12, %s2206_s12, %s2208_s13  }
  0x31   : > { %p28_p1 = scmp.eq.s32.totalorder %s27_s29, 0  ;;  %p37_p2 = scmp.ne.s32.totalorder %s1705_s17, %s1701_s16 }
  0x32   : > { %p38_p4 = scmp.eq.s32.totalorder %s1709_s18, 0  ;;  %p1443_p6 = scmp.lt.s32.totalorder %s1709_s18, 2 }
  0x33   : > { %s1834_s24 = scalar_select %p28_p1, %s1705_s17, %s30_s28  }
  0x34   : > { %p39_p8 = por %p38_p4, %p37_p2  ;;  %p2218_p10 = scmp.eq.s32.totalorder %s1765_s19, 1 }
  0x35   : > { %2217 = sst [smem:[#allocation13_spill]] %s1834_s24  ;;  %s177_s26 = sand.u32 1, %s1705_s17  }
  0x36   : > { %p1838_p12 = por %p2218_p10, %p37_p2  ;;  %s1078_s5 = sshll.u32 %s1709_s18, 12 }
  0x37   : > { %s1844_s6 = sshll.u32 %s177_s26, 8  ;;  %s2220_s0 = sld [smem:[#allocation14_spill]] }
  0x38   : > { %s181_s28 = scalar_lea.vmem [#allocation2], %s1844_s6  ;;  %p1852_p11 = pnand %p1443_p6, %p39_p8 }
  0x39   : > { %s188_s29 = sshll.u32 %s181_s28, 4  ;;  %s1861_s14 = scalar_lea.hbm %s2199_s1, %s1078_s5  ;;  %s1856_s29 = int_to_ptr.vmem [resolvable:$true] %s188_s29 }
  0x3a   : > { %s1863_s20 = scalar_lea.sflag [#allocation3], %s177_s26  ;;  %p1577_p0 = pneg %p1852_p11 }
  0x3d   : > { %s1849_s25 = scalar_lea.hbm %s2220_s0, %s1078_s5  ;;  %s1580_s12 = scalar_lea.hbm %s2220_s0, 8192 }
  0x3e   : > { %s1575_s7 = scalar_lea.hbm %s1849_s25, 4096  ;;  %p1581_p7 = scmp.lt.u32.totalorder %s1849_s25, %s2220_s0 }
  0x3f   : > { %p1576_p13 = scmp.ne.s32.totalorder %s1849_s25, %s1575_s7  ;;  %p1582_p9 = scmp.lt.u32.totalorder %s1580_s12, %s1575_s7 }
  0x40   : > { %p1584_p2 = scmp.lt.u32.totalorder %s1575_s7, %s1849_s25 }
  0x41   : > { %p1578_p3 = pnand %p1577_p0, %p1576_p13  ;;  %p1583_p1 = por %p1582_p9, %p1581_p7 }
  0x43   : > { %p1579_p5 = pneg %p1578_p3  ;;  %p1585_p4 = por %p1584_p2, %p1583_p1 }
  0x45   : > { %p1586_p6 = pnand %p1585_p4, %p1579_p5 }
  0x47   : > { %1589 = shalt.err (!%p1586_p6)
}
  0x48   : > { %s1590_s26 = scalar_lea.vmem %s1856_s29, 4096  ;;  %s1714_s5 = smov [#allocation2]  }
  0x49   : > { %p1591_p8 = scmp.ne.s32.totalorder %s1856_s29, %s1590_s26  ;;  %s1595_s10 = sshll.u32 %s1714_s5, 4  ;;  %s1596_s10 = int_to_ptr.vmem [resolvable:$false] %s1595_s10 }
  0x4a   : > { %s1597_s2 = scalar_lea.vmem %s1596_s10, 8192  ;;  %p1598_p3 = scmp.lt.s32.totalorder %s1856_s29, %s1596_s10 }
  0x4b   : > { %p1593_p10 = pnand %p1591_p8, %p1577_p0  ;;  %p1599_p7 = scmp.lt.s32.totalorder %s1597_s2, %s1590_s26 }
  0x4d   : > { %p1594_p13 = pneg %p1593_p10  ;;  %p1600_p9 = por %p1599_p7, %p1598_p3 }
  0x4f   : > { %p1601_p1 = pnand %p1600_p9, %p1594_p13 }
  0x51   : > { %1604 = shalt.err (!%p1601_p1)
}
  0x52   : > { %s2222_s12 = smov 8   ;;  %s2223_s13 = smov 128  }
  0x53   : > { %1434 = dma.hbm_to_vmem [thread:$0]  (!%p1852_p11), %s1849_s25, 4096, %s1856_s29, %s1863_s20, %s2223_s13, %s2223_s13, %s2222_s12  }
  0x54   : > { %s202_s11 = scalar_lea.vmem [#allocation5], %s1844_s6  ;;  %s198_s8 = sand.u32 1, %s1709_s18  }
  0x55   : > { %s209_s7 = sshll.u32 %s202_s11, 4  ;;  %s1898_s28 = scalar_lea.sflag [#allocation6], %s198_s8  ;;  %s1896_s7 = int_to_ptr.vmem [resolvable:$true] %s209_s7 }
  0x56   : > { %s1605_s26 = scalar_lea.hbm %s1861_s14, 4096  ;;  %s1610_s2 = scalar_lea.hbm %s2199_s1, 8192 }
  0x57   : > { %p1606_p5 = scmp.ne.s32.totalorder %s1861_s14, %s1605_s26  ;;  %p1611_p6 = scmp.lt.u32.totalorder %s1861_s14, %s2199_s1 }
  0x58   : > { %p1612_p8 = scmp.lt.u32.totalorder %s1610_s2, %s1605_s26  ;;  %p1614_p13 = scmp.lt.u32.totalorder %s1605_s26, %s1861_s14 }
  0x59   : > { %p1608_p2 = pnand %p1606_p5, %p1577_p0 }
  0x5a   : > { %p1613_p10 = por %p1612_p8, %p1611_p6 }
  0x5b   : > { %p1609_p4 = pneg %p1608_p2 }
  0x5c   : > { %p1615_p3 = por %p1614_p13, %p1613_p10 }
  0x5e   : > { %p1616_p7 = pnand %p1615_p3, %p1609_p4 }
  0x60   : > { %1619 = shalt.err (!%p1616_p7)
}
  0x61   : > { %s1620_s6 = scalar_lea.vmem %s1896_s7, 4096  ;;  %s1715_s25 = smov [#allocation5]  }
  0x62   : > { %p1621_p9 = scmp.ne.s32.totalorder %s1896_s7, %s1620_s6  ;;  %s1625_s29 = sshll.u32 %s1715_s25, 4  ;;  %s1626_s29 = int_to_ptr.vmem [resolvable:$false] %s1625_s29 }
  0x63   : > { %s1627_s0 = scalar_lea.vmem %s1626_s29, 8192  ;;  %p1628_p2 = scmp.lt.s32.totalorder %s1896_s7, %s1626_s29 }
  0x64   : > { %p1623_p1 = pnand %p1621_p9, %p1577_p0  ;;  %p1629_p6 = scmp.lt.s32.totalorder %s1627_s0, %s1620_s6 }
  0x66   : > { %p1624_p5 = pneg %p1623_p1  ;;  %p1630_p8 = por %p1629_p6, %p1628_p2 }
  0x68   : > { %p1631_p10 = pnand %p1630_p8, %p1624_p5 }
  0x6a   : > { %1634 = shalt.err (!%p1631_p10)
}
  0x6b   : > { %1437 = dma.hbm_to_vmem [thread:$0]  (!%p1852_p11), %s1861_s14, 4096, %s1896_s7, %s1898_s28, %s2223_s13, %s2223_s13, %s2222_s12  }
  0x6c   : > { %p2224_p0 = scmp.ne.s32.totalorder %s2214_s23, 0 }
  0x6d   : > { %s1930_s24 = sand.u32 (!%p2224_p0), 1, %s1701_s16   ;;  %p2225_p4 = scmp.ne.s32.totalorder (!%p2224_p0), %s2212_s21, 0 }
  0x6e   : > { %221 = sbr.rel (%p2224_p0) target bundleno = 678 (0x2a6), region = 36  ;;  %s1933_s20 = sshll.u32 (!%p2224_p0), %s1930_s24, 8 }
  0x6f   : > { %s224_s9 = scalar_lea.sflag (!%p2224_p0), [#allocation3], %s1930_s24  ;;  %s1937_s11 = scalar_lea.vmem (!%p2224_p0), [#allocation2], %s1933_s20 }
  0x75   : > { %1680 = dma.done.wait (%p2225_p4), %s224_s9, 4096  }
  0x76   : > { %1682 = vsyncadd (%p2225_p4), %s224_s9, 4294963200  ;;  %s232_s23 = sand.u32 1, %s1765_s19   ;;  %s1945_s12 = scalar_lea.vmem [#allocation5], %s1933_s20 }
  0x77   : > { %s233_s14 = scalar_lea.sflag [#allocation6], %s232_s23 }
  0x78   : > { %1684 = dma.done.wait (%p2225_p4), %s233_s14, 4096  }
  0x79   : > { %1686 = vsyncadd (%p2225_p4), %s233_s14, 4294963200  ;;  %p2226_p11 = scmp.eq.s32.totalorder %s1765_s19, 0 }
  0x7b   : > { %1688 = dma.done.wait (%p2226_p11), [#allocation6], 2048   ;;  %p2227_p13 = pmov %p2226_p11 }
  0x7c   : > { %v305_v0 = vld [vmem:[#allocation7] sm:$0xff]  ;;  %v306_v1 = vld [vmem:[#allocation7 + $0x8] sm:$0xff]  ;;  %v307_v2 = vld [vmem:[#allocation7 + $0x10] sm:$0xff]  ;;  %s2113_s7 = scalar_lea.vmem [#allocation8], %s1933_s20  ;;  %s1080_s8 = sshll.u32 %s1765_s19, 12 }
  0x7d   : > { %1690 = vsyncadd (%p2227_p13), [#allocation6], 4294965248  ;;  %v1337_v3 = vpack.c.bf16 %v306_v1, %v305_v0  ;;  %v308_v4 = vld [vmem:[#allocation7 + $0x18] sm:$0xff]  ;;  %v309_v6 = vld [vmem:[#allocation7 + $0x20] sm:$0xff]  ;;  %s952_s28 = sshll.u32 %s2113_s7, 4  ;;  %s2150_s10 = scalar_lea.hbm %s2202_s4, %s1080_s8  ;;  %s2152_s28 = int_to_ptr.vmem [resolvable:$true] %s952_s28 }
  0x7e   : > { %v1955_v5 = vpack.c.bf16 %v308_v4, %v307_v2  ;;  %v310_v7 = vld [vmem:[#allocation7 + $0x28] sm:$0xff]  ;;  %v273_v9 = vld [vmem:[%s1937_s11] sm:$0xff]  ;;  %v311_v10 = vld [vmem:[#allocation7 + $0x30] sm:$0xff]  ;;  %s939_s2 = scalar_lea.sflag [#allocation4], %s1930_s24  ;;  %s1635_s19 = scalar_lea.vmem %s2152_s28, 4096 }
  0x7f   : > { %1338 = vmatprep.subr.bf16.mxu0 %v1337_v3  ;;  %1401 = vmatprep.subr.bf16.mxu1 %v1337_v3  ;;  %v1958_v8 = vpack.c.bf16 %v310_v7, %v309_v6  ;;  %v312_v11 = vld [vmem:[#allocation7 + $0x38] sm:$0xff]  ;;  %v313_v13 = vld [vmem:[#allocation7 + $0x40] sm:$0xff]  ;;  %v314_v14 = vld [vmem:[#allocation7 + $0x48] sm:$0xff]  ;;  %p1636_p3 = scmp.ne.s32.totalorder %s2152_s28, %s1635_s19  ;;  %s1716_s6 = smov [#allocation8]  }
  0x80   : > { %1340 = vmatpush3.bf16.msra.mxu0 %v1337_v3  ;;  %1409 = vmatpush3.bf16.xpose.msra.mxu1 %v1337_v3  ;;  %v1964_v12 = vpack.c.bf16 %v312_v11, %v311_v10  ;;  %v1969_v15 = vpack.c.bf16 %v314_v14, %v313_v13  ;;  %v315_v16 = vld [vmem:[#allocation7 + $0x50] sm:$0xff]  ;;  %v316_v17 = vld [vmem:[#allocation7 + $0x58] sm:$0xff]  ;;  %v317_v19 = vld [vmem:[#allocation7 + $0x60] sm:$0xff]  ;;  %s1639_s25 = sshll.u32 %s1716_s6, 4  ;;  %s1640_s25 = int_to_ptr.vmem [resolvable:$false] %s1639_s25 }
  0x81   : > { %1342 = vmatprep.subr.bf16.mxu0 %v1955_v5  ;;  %1402 = vmatprep.subr.bf16.mxu1 %v1955_v5  ;;  %v1974_v18 = vpack.c.bf16 %v316_v17, %v315_v16  ;;  %v318_v20 = vld [vmem:[#allocation7 + $0x68] sm:$0xff]  ;;  %v319_v22 = vld [vmem:[#allocation7 + $0x70] sm:$0xff]  ;;  %v320_v23 = vld [vmem:[#allocation7 + $0x78] sm:$0xff]  ;;  %p1637_p7 = pnand %p1636_p3, %p1838_p12  ;;  %s1641_s29 = scalar_lea.vmem %s1640_s25, 8192 }
  0x82   : > { %1209 = vmatprep.mubr.f32.mxu0 %v273_v9  ;;  %v1979_v21 = vpack.c.bf16 %v318_v20, %v317_v19  ;;  %v1984_v24 = vpack.c.bf16 %v320_v23, %v319_v22  ;;  %v274_v25 = vld [vmem:[%s1937_s11 + $0x8] sm:$0xff]  ;;  %v275_v26 = vld [vmem:[%s1937_s11 + $0x10] sm:$0xff]  ;;  %v276_v27 = vld [vmem:[%s1937_s11 + $0x18] sm:$0xff]  ;;  %p1642_p1 = scmp.lt.s32.totalorder %s2152_s28, %s1640_s25  ;;  %p1643_p5 = scmp.lt.s32.totalorder %s1641_s29, %s1635_s19 }
  0x83   : > { %v277_v28 = vld [vmem:[%s1937_s11 + $0x20] sm:$0xff]  ;;  %v278_v29 = vld [vmem:[%s1937_s11 + $0x28] sm:$0xff]  ;;  %v279_v30 = vld [vmem:[%s1937_s11 + $0x30] sm:$0xff]  ;;  %p1638_p9 = pneg %p1637_p7 }
  0x84   : > { %1344 = vmatpush3.bf16.msra.mxu0 %v1955_v5  ;;  %v280_v31 = vld [vmem:[%s1937_s11 + $0x38] sm:$0xff]  ;;  %v281_v32 = vld [vmem:[%s1937_s11 + $0x40] sm:$0xff]  ;;  %v282_v33 = vld [vmem:[%s1937_s11 + $0x48] sm:$0xff]  ;;  %p1644_p2 = por %p1643_p5, %p1642_p1 }
  0x85   : > { %1346 = vmatprep.subr.bf16.mxu0 %v1958_v8  ;;  %v283_v34 = vld [vmem:[%s1937_s11 + $0x50] sm:$0xff]  ;;  %v284_v35 = vld [vmem:[%s1937_s11 + $0x58] sm:$0xff]  ;;  %v285_v36 = vld [vmem:[%s1937_s11 + $0x60] sm:$0xff] }
  0x86   : > { %v286_v37 = vld [vmem:[%s1937_s11 + $0x68] sm:$0xff]  ;;  %v287_v38 = vld [vmem:[%s1937_s11 + $0x70] sm:$0xff]  ;;  %v288_v39 = vld [vmem:[%s1937_s11 + $0x78] sm:$0xff]  ;;  %p1645_p6 = pnand %p1644_p2, %p1638_p9 }
  0x87   : > { %v289_v40 = vld [vmem:[%s1937_s11 + $0x80] sm:$0xff]  ;;  %v290_v41 = vld [vmem:[%s1937_s11 + $0x88] sm:$0xff]  ;;  %v291_v42 = vld [vmem:[%s1937_s11 + $0x90] sm:$0xff] }
  0x88   : > { %1348 = vmatpush3.bf16.msra.mxu0 %v1958_v8  ;;  %1410 = vmatpush3.bf16.xpose.msra.mxu1 %v1955_v5  ;;  %v292_v43 = vld [vmem:[%s1937_s11 + $0x98] sm:$0xff]  ;;  %v293_v44 = vld [vmem:[%s1937_s11 + $0xa0] sm:$0xff]  ;;  %v294_v45 = vld [vmem:[%s1937_s11 + $0xa8] sm:$0xff] }
  0x89   : > { %1350 = vmatprep.subr.bf16.mxu0 %v1964_v12  ;;  %1403 = vmatprep.subr.bf16.mxu1 %v1958_v8  ;;  %v295_v46 = vld [vmem:[%s1937_s11 + $0xb0] sm:$0xff]  ;;  %v296_v47 = vld [vmem:[%s1937_s11 + $0xb8] sm:$0xff]  ;;  %v297_v48 = vld [vmem:[%s1937_s11 + $0xc0] sm:$0xff] }
  0x8a   : > { %v298_v49 = vld [vmem:[%s1937_s11 + $0xc8] sm:$0xff]  ;;  %v299_v50 = vld [vmem:[%s1937_s11 + $0xd0] sm:$0xff]  ;;  %v300_v51 = vld [vmem:[%s1937_s11 + $0xd8] sm:$0xff] }
  0x8b   : > { %v301_v52 = vld [vmem:[%s1937_s11 + $0xe0] sm:$0xff]  ;;  %v302_v53 = vld [vmem:[%s1937_s11 + $0xe8] sm:$0xff]  ;;  %v303_v54 = vld [vmem:[%s1937_s11 + $0xf0] sm:$0xff] }
  0x8c   : > { %1352 = vmatpush3.bf16.msra.mxu0 %v1964_v12  ;;  %v304_v55 = vld [vmem:[%s1937_s11 + $0xf8] sm:$0xff]  ;;  %v2046_v56 = vld [vmem:[%s2201_s3] ss:$0 sm:$0xff] }
  0x8d   : > { %1354 = vmatprep.subr.bf16.mxu0 %v1969_v15 }
  0x90   : > { %1356 = vmatpush3.bf16.msra.mxu0 %v1969_v15  ;;  %1411 = vmatpush3.bf16.xpose.msra.mxu1 %v1958_v8 }
  0x91   : > { %1358 = vmatprep.subr.bf16.mxu0 %v1974_v18  ;;  %1404 = vmatprep.subr.bf16.mxu1 %v1964_v12 }
  0x94   : > { %1360 = vmatpush3.bf16.msra.mxu0 %v1974_v18 }
  0x95   : > { %1362 = vmatprep.subr.bf16.mxu0 %v1979_v21 }
  0x98   : > { %1364 = vmatpush3.bf16.msra.mxu0 %v1979_v21  ;;  %1412 = vmatpush3.bf16.xpose.msra.mxu1 %v1964_v12 }
  0x99   : > { %1366 = vmatprep.subr.bf16.mxu0 %v1984_v24  ;;  %1405 = vmatprep.subr.bf16.mxu1 %v1969_v15 }
  0x9c   : > { %1368 = vmatpush3.bf16.msra.mxu0 %v1984_v24 }
  0x9d   : > { %1370 = vmatprep.subr.bf16.mxu0 %v1337_v3 }
  0x9f   : > { %1210 = vmatmul.mubr.f32.vlgmr.msra.gmra.mrb[0].mxu0 %v274_v25 }
  0xa0   : > { %1212 = vmatprep.mubr.f32.mxu0 %v275_v26  ;;  %1413 = vmatpush3.bf16.xpose.msra.mxu1 %v1969_v15 }
  0xa1   : > { %1406 = vmatprep.subr.bf16.mxu1 %v1974_v18 }
  0xa3   : > { %1213 = vmatmul.mubr.f32.gmra.mrb[2].mxu0 %v276_v27  ;;  %v587_v27 = vld [vmem:[%s1945_s12 + $0x10] sm:$0xff] }
  0xa4   : > { %1215 = vmatprep.mubr.f32.mxu0 %v277_v28 }
  0xa5   : > { %1372 = vmatpush3.bf16.xpose.msra.mxu0 %v1337_v3 }
  0xa6   : > { %1374 = vmatprep.subr.bf16.mxu0 %v1955_v5 }
  0xa7   : > { %1216 = vmatmul.mubr.f32.gmra.mrb[4].mxu0 %v278_v29 }
  0xa8   : > { %1218 = vmatprep.mubr.f32.mxu0 %v279_v30  ;;  %1414 = vmatpush3.bf16.xpose.msra.mxu1 %v1974_v18  ;;  %v588_v30 = vld [vmem:[%s1945_s12 + $0x18] sm:$0xff] }
  0xa9   : > { %1407 = vmatprep.subr.bf16.mxu1 %v1979_v21 }
  0xab   : > { %1219 = vmatmul.mubr.f32.gmra.mrb[6].mxu0 %v280_v31 }
  0xac   : > { %1221 = vmatprep.mubr.f32.mxu0 %v281_v32 }
  0xad   : > { %1376 = vmatpush3.bf16.xpose.msra.mxu0 %v1955_v5 }
  0xae   : > { %1378 = vmatprep.subr.bf16.mxu0 %v1958_v8 }
  0xaf   : > { %1222 = vmatmul.mubr.f32.gmra.mrb[8].mxu0 %v282_v33 }
  0xb0   : > { %1224 = vmatprep.mubr.f32.mxu0 %v283_v34  ;;  %1415 = vmatpush3.bf16.xpose.msra.mxu1 %v1979_v21 }
  0xb1   : > { %1408 = vmatprep.subr.bf16.mxu1 %v1984_v24 }
  0xb3   : > { %1225 = vmatmul.mubr.f32.gmra.mrb[10].mxu0 %v284_v35 }
  0xb4   : > { %1227 = vmatprep.mubr.f32.mxu0 %v285_v36 }
  0xb5   : > { %1380 = vmatpush3.bf16.xpose.msra.mxu0 %v1958_v8 }
  0xb6   : > { %1382 = vmatprep.subr.bf16.mxu0 %v1964_v12 }
  0xb7   : > { %1228 = vmatmul.mubr.f32.gmra.mrb[12].mxu0 %v286_v37 }
  0xb8   : > { %1230 = vmatprep.mubr.f32.mxu0 %v287_v38  ;;  %1416 = vmatpush3.bf16.xpose.msra.mxu1 %v1984_v24 }
  0xbb   : > { %1231 = vmatmul.mubr.f32.gmra.mrb[14].mxu0 %v288_v39  ;;  %v589_v39 = vld [vmem:[%s1945_s12 + $0x20] sm:$0xff] }
  0xbc   : > { %1233 = vmatprep.mubr.f32.mxu0 %v289_v40 }
  0xbd   : > { %1384 = vmatpush3.bf16.xpose.msra.mxu0 %v1964_v12 }
  0xbe   : > { %1386 = vmatprep.subr.bf16.mxu0 %v1969_v15 }
  0xbf   : > { %1234 = vmatmul.mubr.f32.gmra.mrb[16].mxu0 %v290_v41 }
  0xc0   : > { %1236 = vmatprep.mubr.f32.mxu0 %v291_v42  ;;  %v590_v42 = vld [vmem:[%s1945_s12 + $0x28] sm:$0xff] }
  0xc3   : > { %1237 = vmatmul.mubr.f32.gmra.mrb[18].mxu0 %v292_v43 }
  0xc4   : > { %1239 = vmatprep.mubr.f32.mxu0 %v293_v44 }
  0xc5   : > { %1388 = vmatpush3.bf16.xpose.msra.mxu0 %v1969_v15  ;;  %v585_v15 = vld [vmem:[%s1945_s12] sm:$0xff] }
  0xc6   : > { %1390 = vmatprep.subr.bf16.mxu0 %v1974_v18 }
  0xc7   : > { %1240 = vmatmul.mubr.f32.gmra.mrb[20].mxu0 %v294_v45 }
  0xc8   : > { %1242 = vmatprep.mubr.f32.mxu0 %v295_v46 }
  0xcb   : > { %1243 = vmatmul.mubr.f32.gmra.mrb[22].mxu0 %v296_v47 }
  0xcc   : > { %1245 = vmatprep.mubr.f32.mxu0 %v297_v48 }
  0xcd   : > { %1392 = vmatpush3.bf16.xpose.msra.mxu0 %v1974_v18  ;;  %v586_v18 = vld [vmem:[%s1945_s12 + $0x8] sm:$0xff] }
  0xce   : > { %1394 = vmatprep.subr.bf16.mxu0 %v1979_v21 }
  0xcf   : > { %1246 = vmatmul.mubr.f32.gmra.mrb[24].mxu0 %v298_v49 }
  0xd0   : > { %1248 = vmatprep.mubr.f32.mxu0 %v299_v50 }
  0xd3   : > { %1249 = vmatmul.mubr.f32.gmra.mrb[26].mxu0 %v300_v51  ;;  %v591_v51 = vld [vmem:[%s1945_s12 + $0x30] sm:$0xff] }
  0xd4   : > { %1251 = vmatprep.mubr.f32.mxu0 %v301_v52 }
  0xd5   : > { %1396 = vmatpush3.bf16.xpose.msra.mxu0 %v1979_v21 }
  0xd6   : > { %1398 = vmatprep.subr.bf16.mxu0 %v1984_v24 }
  0xd7   : > { %1252 = vmatmul.mubr.f32.gmra.mrb[28].mxu0 %v302_v53 }
  0xd8   : > { %1254 = vmatprep.mubr.f32.mxu0 %v303_v54  ;;  %v592_v54 = vld [vmem:[%s1945_s12 + $0x38] sm:$0xff] }
  0xdb   : > { %1255 = vmatmul.mubr.f32.gmra.mrb[30].mxu0 %v304_v55 }
  0xdd   : > { %1400 = vmatpush3.bf16.xpose.msra.mxu0 %v1984_v24 }
 0x172   : > { %v1211_v57 = vpop.f32.mrb[0].mxu0 }
 0x173   : > { %v400_v58 = vadd.f32 %v1211_v57, %v2046_v56  ;;  %v394_v59 = vpop.f32.mrb[1].mxu0 }
 0x174   : > { %v395_v60 = vadd.f32 %v2046_v56, %v394_v59 }
 0x175   : > { %v554_v61 = vadd.f32 1e-05, %v400_v58 }
 0x176   : > { %v553_v62 = vadd.f32 1e-05, %v395_v60  ;;  %v1214_v63 = vpop.f32.mrb[2].mxu0 }
 0x177   : > { %1483 = vrcp.f32 %v554_v61  ;;  %v410_v0 = vadd.f32 %v1214_v63, %v2046_v56  ;;  %v404_v1 = vpop.f32.mrb[3].mxu0 }
 0x178   : > { %1485 = vrcp.f32 %v553_v62  ;;  %v405_v2 = vadd.f32 %v2046_v56, %v404_v1 }
 0x179   : > { %v556_v3 = vadd.f32 1e-05, %v410_v0  ;;  %v593_v0 = vld [vmem:[%s1945_s12 + $0x40] sm:$0xff] }
 0x17a   : > { %v555_v4 = vadd.f32 1e-05, %v405_v2  ;;  %v1217_v5 = vpop.f32.mrb[4].mxu0 }
 0x17b   : > { %1487 = vrcp.f32 %v556_v3  ;;  %v420_v6 = vadd.f32 %v1217_v5, %v2046_v56  ;;  %v414_v7 = vpop.f32.mrb[5].mxu0  ;;  %v594_v3 = vld [vmem:[%s1945_s12 + $0x48] sm:$0xff] }
 0x17c   : > { %1489 = vrcp.f32 %v555_v4  ;;  %v415_v8 = vadd.f32 %v2046_v56, %v414_v7 }
 0x17d   : > { %v558_v9 = vadd.f32 1e-05, %v420_v6 }
 0x17e   : > { %v557_v10 = vadd.f32 1e-05, %v415_v8  ;;  %v1220_v11 = vpop.f32.mrb[6].mxu0 }
 0x17f   : > { %1491 = vrcp.f32 %v558_v9  ;;  %v430_v12 = vadd.f32 %v1220_v11, %v2046_v56  ;;  %v424_v13 = vpop.f32.mrb[7].mxu0 }
 0x180   : > { %1493 = vrcp.f32 %v557_v10  ;;  %v425_v14 = vadd.f32 %v2046_v56, %v424_v13 }
 0x181   : > { %v1484_v16 = vpop.eup %1483  ;;  %v560_v17 = vadd.f32 1e-05, %v430_v12  ;;  %v595_v12 = vld [vmem:[%s1945_s12 + $0x50] sm:$0xff] }
 0x182   : > { %v1486_v19 = vpop.eup %1485  ;;  %v559_v20 = vadd.f32 1e-05, %v425_v14  ;;  %v1223_v21 = vpop.f32.mrb[8].mxu0  ;;  %v650_v26 = vmul.f32 %v1484_v16, %v586_v18 }
 0x183   : > { %1495 = vrcp.f32 %v560_v17  ;;  %v440_v22 = vadd.f32 %v1223_v21, %v2046_v56  ;;  %v434_v23 = vpop.f32.mrb[9].mxu0  ;;  %v649_v24 = vmul.f32 %v1486_v19, %v585_v15  ;;  %v596_v15 = vld [vmem:[%s1945_s12 + $0x58] sm:$0xff] }
 0x184   : > { %1497 = vrcp.f32 %v559_v20  ;;  %v435_v25 = vadd.f32 %v2046_v56, %v434_v23 }
 0x185   : > { %v1488_v28 = vpop.eup %1487  ;;  %v562_v29 = vadd.f32 1e-05, %v440_v22  ;;  %1289 = vmatprep.mubr.f32.mxu0 %v649_v24  ;;  %v597_v24 = vld [vmem:[%s1945_s12 + $0x60] sm:$0xff] }
 0x186   : > { %v1490_v31 = vpop.eup %1489  ;;  %v561_v32 = vadd.f32 1e-05, %v435_v25  ;;  %v1226_v33 = vpop.f32.mrb[10].mxu0  ;;  %1290 = vmatmul.mubr.f32.vlgmr.msra.gmra.mrb[32].mxu0 %v650_v26  ;;  %v652_v38 = vmul.f32 %v1488_v28, %v588_v30 }
 0x187   : > { %1499 = vrcp.f32 %v562_v29  ;;  %v450_v34 = vadd.f32 %v1226_v33, %v2046_v56  ;;  %v444_v35 = vpop.f32.mrb[11].mxu0  ;;  %v651_v36 = vmul.f32 %v1490_v31, %v587_v27  ;;  %v598_v27 = vld [vmem:[%s1945_s12 + $0x68] sm:$0xff] }
 0x188   : > { %1501 = vrcp.f32 %v561_v32  ;;  %v445_v37 = vadd.f32 %v2046_v56, %v444_v35 }
 0x189   : > { %v1492_v40 = vpop.eup %1491  ;;  %v564_v41 = vadd.f32 1e-05, %v450_v34  ;;  %1292 = vmatprep.mubr.f32.mxu0 %v651_v36  ;;  %v599_v36 = vld [vmem:[%s1945_s12 + $0x70] sm:$0xff] }
 0x18a   : > { %v1494_v43 = vpop.eup %1493  ;;  %v563_v44 = vadd.f32 1e-05, %v445_v37  ;;  %v1229_v45 = vpop.f32.mrb[12].mxu0  ;;  %1293 = vmatmul.mubr.f32.gmra.mrb[34].mxu0 %v652_v38  ;;  %v654_v50 = vmul.f32 %v1492_v40, %v590_v42 }
 0x18b   : > { %1503 = vrcp.f32 %v564_v41  ;;  %v460_v46 = vadd.f32 %v1229_v45, %v2046_v56  ;;  %v454_v47 = vpop.f32.mrb[13].mxu0  ;;  %v653_v48 = vmul.f32 %v1494_v43, %v589_v39  ;;  %v600_v39 = vld [vmem:[%s1945_s12 + $0x78] sm:$0xff] }
 0x18c   : > { %1505 = vrcp.f32 %v563_v44  ;;  %v455_v49 = vadd.f32 %v2046_v56, %v454_v47 }
 0x18d   : > { %v1496_v52 = vpop.eup %1495  ;;  %v566_v53 = vadd.f32 1e-05, %v460_v46  ;;  %1295 = vmatprep.mubr.f32.mxu0 %v653_v48  ;;  %v601_v48 = vld [vmem:[%s1945_s12 + $0x80] sm:$0xff] }
 0x18e   : > { %v1498_v55 = vpop.eup %1497  ;;  %v565_v57 = vadd.f32 1e-05, %v455_v49  ;;  %v1232_v58 = vpop.f32.mrb[14].mxu0  ;;  %1296 = vmatmul.mubr.f32.gmra.mrb[36].mxu0 %v654_v50  ;;  %v656_v63 = vmul.f32 %v1496_v52, %v592_v54 }
 0x18f   : > { %1507 = vrcp.f32 %v566_v53  ;;  %v470_v59 = vadd.f32 %v1232_v58, %v2046_v56  ;;  %v464_v60 = vpop.f32.mrb[15].mxu0  ;;  %v655_v61 = vmul.f32 %v1498_v55, %v591_v51  ;;  %v602_v51 = vld [vmem:[%s1945_s12 + $0x88] sm:$0xff] }
 0x190   : > { %1509 = vrcp.f32 %v565_v57  ;;  %v465_v62 = vadd.f32 %v2046_v56, %v464_v60 }
 0x191   : > { %v1500_v1 = vpop.eup %1499  ;;  %v568_v2 = vadd.f32 1e-05, %v470_v59  ;;  %1298 = vmatprep.mubr.f32.mxu0 %v655_v61  ;;  %v603_v61 = vld [vmem:[%s1945_s12 + $0x90] sm:$0xff] }
 0x192   : > { %v1502_v4 = vpop.eup %1501  ;;  %v567_v5 = vadd.f32 1e-05, %v465_v62  ;;  %v1235_v6 = vpop.f32.mrb[16].mxu0  ;;  %1299 = vmatmul.mubr.f32.gmra.mrb[38].mxu0 %v656_v63  ;;  %v658_v11 = vmul.f32 %v1500_v1, %v594_v3 }
 0x193   : > { %1511 = vrcp.f32 %v568_v2  ;;  %v480_v7 = vadd.f32 %v1235_v6, %v2046_v56  ;;  %v474_v8 = vpop.f32.mrb[17].mxu0  ;;  %v657_v9 = vmul.f32 %v1502_v4, %v593_v0  ;;  %v604_v0 = vld [vmem:[%s1945_s12 + $0x98] sm:$0xff] }
 0x194   : > { %1513 = vrcp.f32 %v567_v5  ;;  %v475_v10 = vadd.f32 %v2046_v56, %v474_v8 }
 0x195   : > { %v1504_v13 = vpop.eup %1503  ;;  %v570_v14 = vadd.f32 1e-05, %v480_v7  ;;  %1301 = vmatprep.mubr.f32.mxu1 %v657_v9  ;;  %v605_v9 = vld [vmem:[%s1945_s12 + $0xa0] sm:$0xff] }
 0x196   : > { %v1506_v16 = vpop.eup %1505  ;;  %v569_v17 = vadd.f32 1e-05, %v475_v10  ;;  %v1238_v18 = vpop.f32.mrb[18].mxu0  ;;  %1302 = vmatmul.mubr.f32.vlgmr.msra.gmra.mrb[0].mxu1 %v658_v11  ;;  %v660_v23 = vmul.f32 %v1504_v13, %v596_v15 }
 0x197   : > { %1515 = vrcp.f32 %v570_v14  ;;  %v490_v19 = vadd.f32 %v1238_v18, %v2046_v56  ;;  %v484_v20 = vpop.f32.mrb[19].mxu0  ;;  %v659_v21 = vmul.f32 %v1506_v16, %v595_v12  ;;  %v606_v12 = vld [vmem:[%s1945_s12 + $0xa8] sm:$0xff] }
 0x198   : > { %1517 = vrcp.f32 %v569_v17  ;;  %v485_v22 = vadd.f32 %v2046_v56, %v484_v20 }
 0x199   : > { %v1508_v25 = vpop.eup %1507  ;;  %v572_v26 = vadd.f32 1e-05, %v490_v19  ;;  %1304 = vmatprep.mubr.f32.mxu1 %v659_v21  ;;  %v607_v21 = vld [vmem:[%s1945_s12 + $0xb0] sm:$0xff] }
 0x19a   : > { %v1510_v28 = vpop.eup %1509  ;;  %v571_v29 = vadd.f32 1e-05, %v485_v22  ;;  %v1241_v30 = vpop.f32.mrb[20].mxu0  ;;  %1305 = vmatmul.mubr.f32.gmra.mrb[2].mxu1 %v660_v23  ;;  %v662_v35 = vmul.f32 %v1508_v25, %v598_v27 }
 0x19b   : > { %1519 = vrcp.f32 %v572_v26  ;;  %v500_v31 = vadd.f32 %v1241_v30, %v2046_v56  ;;  %v494_v32 = vpop.f32.mrb[21].mxu0  ;;  %v661_v33 = vmul.f32 %v1510_v28, %v597_v24  ;;  %v608_v24 = vld [vmem:[%s1945_s12 + $0xb8] sm:$0xff] }
 0x19c   : > { %1521 = vrcp.f32 %v571_v29  ;;  %v495_v34 = vadd.f32 %v2046_v56, %v494_v32 }
 0x19d   : > { %v1512_v37 = vpop.eup %1511  ;;  %v574_v38 = vadd.f32 1e-05, %v500_v31  ;;  %1307 = vmatprep.mubr.f32.mxu1 %v661_v33  ;;  %v609_v33 = vld [vmem:[%s1945_s12 + $0xc0] sm:$0xff] }
 0x19e   : > { %v1514_v40 = vpop.eup %1513  ;;  %v573_v41 = vadd.f32 1e-05, %v495_v34  ;;  %v1244_v42 = vpop.f32.mrb[22].mxu0  ;;  %1308 = vmatmul.mubr.f32.gmra.mrb[4].mxu1 %v662_v35  ;;  %v664_v47 = vmul.f32 %v1512_v37, %v600_v39 }
 0x19f   : > { %1523 = vrcp.f32 %v574_v38  ;;  %v510_v43 = vadd.f32 %v1244_v42, %v2046_v56  ;;  %v504_v44 = vpop.f32.mrb[23].mxu0  ;;  %v663_v45 = vmul.f32 %v1514_v40, %v599_v36  ;;  %v610_v36 = vld [vmem:[%s1945_s12 + $0xc8] sm:$0xff] }
 0x1a0   : > { %1525 = vrcp.f32 %v573_v41  ;;  %v505_v46 = vadd.f32 %v2046_v56, %v504_v44  ;;  %v611_v41 = vld [vmem:[%s1945_s12 + $0xd0] sm:$0xff] }
 0x1a1   : > { %v1516_v49 = vpop.eup %1515  ;;  %v576_v50 = vadd.f32 1e-05, %v510_v43  ;;  %1310 = vmatprep.mubr.f32.mxu1 %v663_v45 }
 0x1a2   : > { %v1518_v52 = vpop.eup %1517  ;;  %v575_v53 = vadd.f32 1e-05, %v505_v46  ;;  %v1247_v54 = vpop.f32.mrb[24].mxu0  ;;  %1311 = vmatmul.mubr.f32.gmra.mrb[6].mxu1 %v664_v47  ;;  %v666_v60 = vmul.f32 %v1516_v49, %v602_v51  ;;  %v613_v46 = vld [vmem:[%s1945_s12 + $0xe0] sm:$0xff] }
 0x1a3   : > { %1527 = vrcp.f32 %v576_v50  ;;  %v520_v55 = vadd.f32 %v1247_v54, %v2046_v56  ;;  %v514_v57 = vpop.f32.mrb[25].mxu0  ;;  %v665_v58 = vmul.f32 %v1518_v52, %v601_v48  ;;  %v614_v48 = vld [vmem:[%s1945_s12 + $0xe8] sm:$0xff]  ;;  %v615_v52 = vld [vmem:[%s1945_s12 + $0xf0] sm:$0xff]  ;;  %v616_v54 = vld [vmem:[%s1945_s12 + $0xf8] sm:$0xff] }
 0x1a4   : > { %1529 = vrcp.f32 %v575_v53  ;;  %v515_v59 = vadd.f32 %v2046_v56, %v514_v57 }
 0x1a5   : > { %v1520_v62 = vpop.eup %1519  ;;  %v578_v63 = vadd.f32 1e-05, %v520_v55  ;;  %1313 = vmatprep.mubr.f32.mxu1 %v665_v58 }
 0x1a6   : > { %v1522_v1 = vpop.eup %1521  ;;  %v577_v2 = vadd.f32 1e-05, %v515_v59  ;;  %v1250_v3 = vpop.f32.mrb[26].mxu0  ;;  %1314 = vmatmul.mubr.f32.gmra.mrb[8].mxu1 %v666_v60  ;;  %v668_v8 = vmul.f32 %v1520_v62, %v604_v0 }
 0x1a7   : > { %1531 = vrcp.f32 %v578_v63  ;;  %v530_v4 = vadd.f32 %v1250_v3, %v2046_v56  ;;  %v524_v5 = vpop.f32.mrb[27].mxu0  ;;  %v667_v6 = vmul.f32 %v1522_v1, %v603_v61 }
 0x1a8   : > { %1533 = vrcp.f32 %v577_v2  ;;  %v525_v7 = vadd.f32 %v2046_v56, %v524_v5 }
 0x1a9   : > { %v1524_v10 = vpop.eup %1523  ;;  %v580_v11 = vadd.f32 1e-05, %v530_v4  ;;  %1316 = vmatprep.mubr.f32.mxu1 %v667_v6 }
 0x1aa   : > { %v1526_v13 = vpop.eup %1525  ;;  %v579_v14 = vadd.f32 1e-05, %v525_v7  ;;  %v1253_v15 = vpop.f32.mrb[28].mxu0  ;;  %1317 = vmatmul.mubr.f32.gmra.mrb[10].mxu1 %v668_v8  ;;  %v670_v20 = vmul.f32 %v1524_v10, %v606_v12 }
 0x1ab   : > { %1535 = vrcp.f32 %v580_v11  ;;  %v540_v16 = vadd.f32 %v1253_v15, %v2046_v56  ;;  %v534_v17 = vpop.f32.mrb[29].mxu0  ;;  %v669_v18 = vmul.f32 %v1526_v13, %v605_v9 }
 0x1ac   : > { %1537 = vrcp.f32 %v579_v14  ;;  %v535_v19 = vadd.f32 %v2046_v56, %v534_v17 }
 0x1ad   : > { %v1528_v22 = vpop.eup %1527  ;;  %v582_v23 = vadd.f32 1e-05, %v540_v16  ;;  %1319 = vmatprep.mubr.f32.mxu1 %v669_v18 }
 0x1ae   : > { %v1530_v25 = vpop.eup %1529  ;;  %v581_v26 = vadd.f32 1e-05, %v535_v19  ;;  %v1256_v27 = vpop.f32.mrb[30].mxu0  ;;  %1320 = vmatmul.mubr.f32.gmra.mrb[12].mxu1 %v670_v20  ;;  %v672_v32 = vmul.f32 %v1528_v22, %v608_v24 }
 0x1af   : > { %1539 = vrcp.f32 %v582_v23  ;;  %v550_v28 = vadd.f32 %v1256_v27, %v2046_v56  ;;  %v544_v29 = vpop.f32.mrb[31].mxu0  ;;  %v671_v30 = vmul.f32 %v1530_v25, %v607_v21 }
 0x1b0   : > { %1541 = vrcp.f32 %v581_v26  ;;  %v545_v31 = vadd.f32 %v2046_v56, %v544_v29  ;;  %v612_v56 = vld [vmem:[%s1945_s12 + $0xd8] sm:$0xff] }
 0x1b1   : > { %v1532_v34 = vpop.eup %1531  ;;  %v584_v35 = vadd.f32 1e-05, %v550_v28  ;;  %1322 = vmatprep.mubr.f32.mxu1 %v671_v30 }
 0x1b2   : > { %v1534_v37 = vpop.eup %1533  ;;  %v583_v38 = vadd.f32 1e-05, %v545_v31  ;;  %1323 = vmatmul.mubr.f32.gmra.mrb[14].mxu1 %v672_v32  ;;  %v674_v40 = vmul.f32 %v1532_v34, %v610_v36 }
 0x1b3   : > { %1543 = vrcp.f32 %v584_v35  ;;  %v673_v39 = vmul.f32 %v1534_v37, %v609_v33 }
 0x1b4   : > { %1545 = vrcp.f32 %v583_v38 }
 0x1b5   : > { %v1536_v42 = vpop.eup %1535  ;;  %1325 = vmatprep.mubr.f32.mxu1 %v673_v39 }
 0x1b6   : > { %v1538_v43 = vpop.eup %1537  ;;  %1326 = vmatmul.mubr.f32.gmra.mrb[16].mxu1 %v674_v40  ;;  %v676_v45 = vmul.f32 %v1536_v42, %v612_v56 }
 0x1b7   : > { %v675_v44 = vmul.f32 %v1538_v43, %v611_v41 }
 0x1b9   : > { %v1540_v47 = vpop.eup %1539  ;;  %1328 = vmatprep.mubr.f32.mxu1 %v675_v44 }
 0x1ba   : > { %v1542_v49 = vpop.eup %1541  ;;  %1329 = vmatmul.mubr.f32.gmra.mrb[18].mxu1 %v676_v45  ;;  %v678_v51 = vmul.f32 %v1540_v47, %v614_v48 }
 0x1bb   : > { %v677_v50 = vmul.f32 %v1542_v49, %v613_v46 }
 0x1bd   : > { %v1544_v53 = vpop.eup %1543  ;;  %1331 = vmatprep.mubr.f32.mxu1 %v677_v50 }
 0x1be   : > { %v1546_v55 = vpop.eup %1545  ;;  %1332 = vmatmul.mubr.f32.gmra.mrb[20].mxu1 %v678_v51  ;;  %v680_v58 = vmul.f32 %v1544_v53, %v616_v54 }
 0x1bf   : > { %v679_v57 = vmul.f32 %v1546_v55, %v615_v52 }
 0x1c1   : > { %1334 = vmatprep.mubr.f32.mxu1 %v679_v57 }
 0x1c2   : > { %1335 = vmatmul.mubr.f32.gmra.mrb[22].mxu1 %v680_v58 }
 0x259   : > { %v1291_v59 = vpop.f32.mrb[32].mxu0 }
 0x25a   : > { %907 = vst [vmem:[%s2113_s7 + $0x8] sm:$0xff] %v1291_v59  ;;  %v747_v60 = vpop.f32.mrb[33].mxu0 }
 0x25b   : > { %906 = vst [vmem:[%s2113_s7] sm:$0xff] %v747_v60 }
 0x25d   : > { %v1294_v61 = vpop.f32.mrb[34].mxu0 }
 0x25e   : > { %909 = vst [vmem:[%s2113_s7 + $0x18] sm:$0xff] %v1294_v61  ;;  %v757_v62 = vpop.f32.mrb[35].mxu0 }
 0x25f   : > { %908 = vst [vmem:[%s2113_s7 + $0x10] sm:$0xff] %v757_v62 }
 0x261   : > { %v1297_v63 = vpop.f32.mrb[36].mxu0 }
 0x262   : > { %911 = vst [vmem:[%s2113_s7 + $0x28] sm:$0xff] %v1297_v63  ;;  %v767_v0 = vpop.f32.mrb[37].mxu0 }
 0x263   : > { %910 = vst [vmem:[%s2113_s7 + $0x20] sm:$0xff] %v767_v0 }
 0x265   : > { %v1300_v1 = vpop.f32.mrb[38].mxu0 }
 0x266   : > { %913 = vst [vmem:[%s2113_s7 + $0x38] sm:$0xff] %v1300_v1  ;;  %v777_v2 = vpop.f32.mrb[39].mxu0 }
 0x267   : > { %912 = vst [vmem:[%s2113_s7 + $0x30] sm:$0xff] %v777_v2 }
 0x269   : > { %v1303_v3 = vpop.f32.mrb[0].mxu1 }
 0x26a   : > { %915 = vst [vmem:[%s2113_s7 + $0x48] sm:$0xff] %v1303_v3  ;;  %v787_v4 = vpop.f32.mrb[1].mxu1 }
 0x26b   : > { %914 = vst [vmem:[%s2113_s7 + $0x40] sm:$0xff] %v787_v4 }
 0x26d   : > { %v1306_v5 = vpop.f32.mrb[2].mxu1 }
 0x26e   : > { %917 = vst [vmem:[%s2113_s7 + $0x58] sm:$0xff] %v1306_v5  ;;  %v797_v6 = vpop.f32.mrb[3].mxu1 }
 0x26f   : > { %916 = vst [vmem:[%s2113_s7 + $0x50] sm:$0xff] %v797_v6 }
 0x271   : > { %v1309_v7 = vpop.f32.mrb[4].mxu1 }
 0x272   : > { %919 = vst [vmem:[%s2113_s7 + $0x68] sm:$0xff] %v1309_v7  ;;  %v807_v8 = vpop.f32.mrb[5].mxu1 }
 0x273   : > { %918 = vst [vmem:[%s2113_s7 + $0x60] sm:$0xff] %v807_v8 }
 0x275   : > { %v1312_v9 = vpop.f32.mrb[6].mxu1 }
 0x276   : > { %921 = vst [vmem:[%s2113_s7 + $0x78] sm:$0xff] %v1312_v9  ;;  %v817_v10 = vpop.f32.mrb[7].mxu1 }
 0x277   : > { %920 = vst [vmem:[%s2113_s7 + $0x70] sm:$0xff] %v817_v10 }
 0x279   : > { %v1315_v11 = vpop.f32.mrb[8].mxu1 }
 0x27a   : > { %923 = vst [vmem:[%s2113_s7 + $0x88] sm:$0xff] %v1315_v11  ;;  %v827_v12 = vpop.f32.mrb[9].mxu1 }
 0x27b   : > { %922 = vst [vmem:[%s2113_s7 + $0x80] sm:$0xff] %v827_v12 }
 0x27d   : > { %v1318_v13 = vpop.f32.mrb[10].mxu1 }
 0x27e   : > { %925 = vst [vmem:[%s2113_s7 + $0x98] sm:$0xff] %v1318_v13  ;;  %v837_v14 = vpop.f32.mrb[11].mxu1 }
 0x27f   : > { %924 = vst [vmem:[%s2113_s7 + $0x90] sm:$0xff] %v837_v14 }
 0x281   : > { %v1321_v15 = vpop.f32.mrb[12].mxu1 }
 0x282   : > { %927 = vst [vmem:[%s2113_s7 + $0xa8] sm:$0xff] %v1321_v15  ;;  %v847_v16 = vpop.f32.mrb[13].mxu1 }
 0x283   : > { %926 = vst [vmem:[%s2113_s7 + $0xa0] sm:$0xff] %v847_v16 }
 0x285   : > { %v1324_v17 = vpop.f32.mrb[14].mxu1 }
 0x286   : > { %929 = vst [vmem:[%s2113_s7 + $0xb8] sm:$0xff] %v1324_v17  ;;  %v857_v18 = vpop.f32.mrb[15].mxu1 }
 0x287   : > { %928 = vst [vmem:[%s2113_s7 + $0xb0] sm:$0xff] %v857_v18 }
 0x289   : > { %v1327_v19 = vpop.f32.mrb[16].mxu1 }
 0x28a   : > { %931 = vst [vmem:[%s2113_s7 + $0xc8] sm:$0xff] %v1327_v19  ;;  %v867_v20 = vpop.f32.mrb[17].mxu1 }
 0x28b   : > { %930 = vst [vmem:[%s2113_s7 + $0xc0] sm:$0xff] %v867_v20 }
 0x28d   : > { %v1330_v21 = vpop.f32.mrb[18].mxu1 }
 0x28e   : > { %933 = vst [vmem:[%s2113_s7 + $0xd8] sm:$0xff] %v1330_v21  ;;  %v877_v22 = vpop.f32.mrb[19].mxu1 }
 0x28f   : > { %932 = vst [vmem:[%s2113_s7 + $0xd0] sm:$0xff] %v877_v22 }
 0x291   : > { %v1333_v23 = vpop.f32.mrb[20].mxu1 }
 0x292   : > { %935 = vst [vmem:[%s2113_s7 + $0xe8] sm:$0xff] %v1333_v23  ;;  %v887_v24 = vpop.f32.mrb[21].mxu1 }
 0x293   : > { %934 = vst [vmem:[%s2113_s7 + $0xe0] sm:$0xff] %v887_v24 }
 0x295   : > { %v1336_v25 = vpop.f32.mrb[22].mxu1 }
 0x296   : > { %937 = vst [vmem:[%s2113_s7 + $0xf8] sm:$0xff] %v1336_v25  ;;  %v897_v26 = vpop.f32.mrb[23].mxu1 }
 0x297   : > { %936 = vst [vmem:[%s2113_s7 + $0xf0] sm:$0xff] %v897_v26 }
 0x298   : > { %1648 = shalt.err (!%p1645_p6)
}
 0x299   : > { %s1649_s0 = scalar_lea.hbm %s2150_s10, 4096  ;;  %s1653_s11 = scalar_lea.hbm %s2202_s4, 8192 }
 0x29a   : > { %p1650_p8 = scmp.ne.s32.totalorder %s2150_s10, %s1649_s0  ;;  %p1654_p4 = scmp.lt.u32.totalorder %s2150_s10, %s2202_s4 }
 0x29b   : > { %p1655_p11 = scmp.lt.u32.totalorder %s1653_s11, %s1649_s0  ;;  %p1657_p3 = scmp.lt.u32.totalorder %s1649_s0, %s2150_s10 }
 0x29c   : > { %p1651_p10 = pnand %p1650_p8, %p1838_p12 }
 0x29d   : > { %p1656_p13 = por %p1655_p11, %p1654_p4 }
 0x29e   : > { %p1652_p0 = pneg %p1651_p10 }
 0x29f   : > { %p1658_p7 = por %p1657_p3, %p1656_p13 }
 0x2a1   : > { %p1659_p9 = pnand %p1658_p7, %p1652_p0 }
 0x2a3   : > { %1662 = shalt.err (!%p1659_p9)
}
 0x2a4   : > { %s1717_s12 = smov 128   ;;  %s1718_s21 = smov 8  }
 0x2a5   : > { %1425 = dma.vmem_to_hbm [thread:$0]  (%p1838_p12), %s2152_s28, 4096, %s2150_s10, %s939_s2, %s1717_s12, %s1717_s12, %s1718_s21  }
 0x2a6 PF: > { %s967_s13 = sand.u32 1, %s1697_s15   ;;  %p2228_p1 = scmp.ne.s32.totalorder %s2213_s22, 0 }
 0x2a7   : > { %p2229_p5 = scmp.ge.s32.totalorder %s1709_s18, 2  ;;  %s968_s7 = scalar_lea.sflag [#allocation4], %s967_s13 }
 0x2a9   : > { %p1439_p2 = pnand %p2229_p5, %p2228_p1 }
 0x2ab   : > { %1692 = dma.done.wait (!%p1439_p2), %s968_s7, 4096  }
 0x2ac   : > { %1694 = vsyncadd (!%p1439_p2), %s968_s7, 4294963200  ;;  %s2230_s8 = sld [smem:[#allocation13_spill]]  ;;  %p20_p6 = scmp.ge.s32.totalorder %s1800_s27, 4  }
 0x2ad   : > { %s2231_s15 = smov %s1701_s16  ;;  %s2232_s16 = smov %s1705_s17 }
 0x2ae   : > { %s2234_s18 = smov %s1800_s27  ;;  %22 = sbr.rel (!%p20_p6) target bundleno = 10 (0xa), region = 98 }
 0x2b2   : > { %s2233_s17 = smov %s2230_s8 }
 0x2b5   :  { %973 = vsyncpa [#allocation3], 1 }
 0x2b6   :  { %975 = vsyncpa [#allocation3 + $0x1], 1 }
 0x2b7   :  { %976 = vsyncpa [#allocation6], 1 }
 0x2b8   :  { %978 = vsyncpa [#allocation6 + $0x1], 1 }
 0x2b9   :  { %979 = vsyncpa [#allocation4], 1 }
 0x2ba   :  { %981 = vsyncpa [#allocation4 + $0x1], 1 }

</bundles_post_ra>
